<compile_context>
chip_gen: v7x
topology: tpu7x:2x2x1
jax: 0.10.0
libtpu: 0.0.40
codegen_flags: <defaults>
</compile_context>

<pallas_src>
import functools
import math

import jax
import jax.numpy as jnp
from jax.experimental import pallas as pl
from jax.experimental.pallas import tpu as pltpu


_BF16 = jnp.bfloat16
_VMEM_LIMIT = 32 * 1024 * 1024   # safe scoped-VMEM budget on v5e / v6e / v7x
_MAX_ROW_TILE = 512              # row tile cap for dense / ffn / layernorm
_MAX_Q_TILE = 256                # query-row tile cap for attention


# ------------------------------ small helpers -------------------------------

def _pick_tile(n, cap):
    """Largest MXU-friendly tile <= cap that divides n (falls back to n)."""
    for t in (512, 256, 128, 64, 32, 16, 8):
        if t <= cap and n % t == 0:
            return t
    return n


def _gelu(y):
    # TODO(synk): HF BERT uses exact erf-GELU; tanh approximation used here.
    return 0.5 * y * (1.0 + jnp.tanh(0.7978845608028654 * (y + 0.044715 * y * y * y)))


def _layernorm(y, g, b, eps):
    mu = jnp.mean(y, axis=-1, keepdims=True)
    var = jnp.mean(jnp.square(y - mu), axis=-1, keepdims=True)
    return (y - mu) * jax.lax.rsqrt(var + eps) * g + b


# ----------------------------- Pallas kernels ------------------------------

def _dense_kernel(x_ref, w_ref, b_ref, o_ref):
    y = jnp.dot(x_ref[...].astype(_BF16), w_ref[...],
                preferred_element_type=jnp.float32) + b_ref[...]
    o_ref[...] = y.astype(o_ref.dtype)


def dense(x, w, b):
    """y = x @ w + b ; x bf16 [M,K], w bf16 [K,N]; bf16 output; row-tiled."""
    M, K = x.shape
    N = w.shape[1]
    tm = _pick_tile(M, _MAX_ROW_TILE)
    return pl.pallas_call(
        _dense_kernel,
        out_shape=jax.ShapeDtypeStruct((M, N), _BF16),
        grid=(M // tm,),
        in_specs=[pl.BlockSpec((tm, K), lambda i: (i, 0)),
                  pl.BlockSpec((K, N), lambda i: (0, 0)),
                  pl.BlockSpec((1, N), lambda i: (0, 0))],
        out_specs=pl.BlockSpec((tm, N), lambda i: (i, 0)),
        compiler_params=pltpu.CompilerParams(
            dimension_semantics=("parallel",),
            vmem_limit_bytes=_VMEM_LIMIT),
    )(x, w, b.reshape(1, N))


def _ln_kernel(x_ref, g_ref, b_ref, o_ref, *, eps):
    y = _layernorm(x_ref[...].astype(jnp.float32), g_ref[...], b_ref[...], eps)
    o_ref[...] = y.astype(o_ref.dtype)


def layernorm(x, gamma, beta, eps=1e-12):
    """Residual-free LayerNorm, gridded over row tiles; bf16 output."""
    M, H = x.shape
    tm = _pick_tile(M, _MAX_ROW_TILE)
    return pl.pallas_call(
        functools.partial(_ln_kernel, eps=eps),
        out_shape=jax.ShapeDtypeStruct((M, H), _BF16),
        grid=(M // tm,),
        in_specs=[pl.BlockSpec((tm, H), lambda i: (i, 0)),
                  pl.BlockSpec((1, H), lambda i: (0, 0)),
                  pl.BlockSpec((1, H), lambda i: (0, 0))],
        out_specs=pl.BlockSpec((tm, H), lambda i: (i, 0)),
        compiler_params=pltpu.CompilerParams(
            dimension_semantics=("parallel",),
            vmem_limit_bytes=_VMEM_LIMIT),
    )(x, gamma.reshape(1, H), beta.reshape(1, H))


def _attn_out_ln_kernel(q_ref, k_ref, v_ref, m_ref, r_ref, wo_ref, bo_ref,
                        g_ref, b_ref, o_ref, *, scale, nh, hd, eps):
    tq = q_ref.shape[1]
    S = k_ref.shape[1]
    H = nh * hd
    # (tq|S, H) bf16 -> (nh, tq|S, hd) for a single batched contraction per step
    q = jnp.transpose(q_ref[0].reshape(tq, nh, hd), (1, 0, 2))
    k = jnp.transpose(k_ref[0].reshape(S, nh, hd), (1, 0, 2))
    v = jnp.transpose(v_ref[0].reshape(S, nh, hd), (1, 0, 2))
    s = jnp.einsum('hqd,hkd->hqk', q, k,
                   preferred_element_type=jnp.float32) * scale
    s = s + m_ref[0]                                   # (1, S) additive mask
    mx = jnp.max(s, axis=-1, keepdims=True)
    p = jnp.exp(s - mx)
    p = p * pl.reciprocal(jnp.sum(p, axis=-1, keepdims=True), approx=True)
    ctx = jnp.einsum('hqk,hkd->hqd', p.astype(_BF16), v,
                     preferred_element_type=jnp.float32)          # (nh, tq, hd)
    ctx = jnp.transpose(ctx, (1, 0, 2)).reshape(tq, H)            # merge heads
    # fused attention-output projection + residual + LayerNorm epilogue
    y = jnp.dot(ctx.astype(_BF16), wo_ref[...],
                preferred_element_type=jnp.float32) + bo_ref[...]
    y = y + r_ref[0].astype(jnp.float32)
    o_ref[0] = _layernorm(y, g_ref[...], b_ref[...], eps).astype(o_ref.dtype)
    # TODO(synk): for S >= 1024 switch to a flash-style online-softmax over KV tiles.


def attention_out_ln(qkv3, mask, res3, wo, bo, gamma, beta, scale, num_heads,
                     eps=1e-12):
    """LayerNorm(MHA(qkv) @ wo + bo + res); qkv3 (B,S,3H) bf16, mask (B,1,S) f32."""
    B, S, H3 = qkv3.shape
    H = H3 // 3
    hd = H // num_heads
    tq = _pick_tile(S, _MAX_Q_TILE)
    return pl.pallas_call(
        functools.partial(_attn_out_ln_kernel, scale=scale, nh=num_heads,
                          hd=hd, eps=eps),
        out_shape=jax.ShapeDtypeStruct((B, S, H), _BF16),
        grid=(B, S // tq),
        in_specs=[
            pl.BlockSpec((1, tq, H), lambda b, q: (b, q, 0)),   # Q rows (col blk 0)
            pl.BlockSpec((1, S, H), lambda b, q: (b, 0, 1)),    # K full  (col blk 1)
            pl.BlockSpec((1, S, H), lambda b, q: (b, 0, 2)),    # V full  (col blk 2)
            pl.BlockSpec((1, 1, S), lambda b, q: (b, 0, 0)),    # additive mask
            pl.BlockSpec((1, tq, H), lambda b, q: (b, q, 0)),   # residual x
            pl.BlockSpec((H, H), lambda b, q: (0, 0)),          # wo (resident)
            pl.BlockSpec((1, H), lambda b, q: (0, 0)),          # bo
            pl.BlockSpec((1, H), lambda b, q: (0, 0)),          # ln gamma
            pl.BlockSpec((1, H), lambda b, q: (0, 0)),          # ln beta
        ],
        out_specs=pl.BlockSpec((1, tq, H), lambda b, q: (b, q, 0)),
        compiler_params=pltpu.CompilerParams(
            dimension_semantics=("parallel", "parallel"),
            vmem_limit_bytes=_VMEM_LIMIT),
    )(qkv3, qkv3, qkv3, mask, res3, wo, bo.reshape(1, H),
      gamma.reshape(1, H), beta.reshape(1, H))


def _ffn_kernel(x_ref, w1_ref, b1_ref, w2_ref, b2_ref, r_ref, g_ref, bb_ref,
                o_ref, acc_ref, *, eps):
    j = pl.program_id(1)

    @pl.when(j == 0)
    def _():
        acc_ref[...] = jnp.zeros_like(acc_ref)

    h = jnp.dot(x_ref[...].astype(_BF16), w1_ref[...],
                preferred_element_type=jnp.float32) + b1_ref[...]
    h = _gelu(h)
    acc_ref[...] += jnp.dot(h.astype(_BF16), w2_ref[...],
                            preferred_element_type=jnp.float32)

    @pl.when(j == pl.num_programs(1) - 1)
    def _():
        y = acc_ref[...] + b2_ref[...] + r_ref[...].astype(jnp.float32)
        o_ref[...] = _layernorm(y, g_ref[...], bb_ref[...], eps).astype(o_ref.dtype)


def ffn(x, w1, b1, w2, b2, res, gamma, beta, eps=1e-12):
    """LayerNorm(gelu(x@w1+b1)@w2 + b2 + res); intermediate dim tiled in VMEM."""
    M, H = x.shape
    I = w1.shape[1]
    tm = _pick_tile(M, _MAX_ROW_TILE)
    if I <= 1536:
        ti = I
    else:
        ti = I
        for cand in (1536, 1024, 512, 256):
            if I % cand == 0:
                ti = cand
                break
    return pl.pallas_call(
        functools.partial(_ffn_kernel, eps=eps),
        out_shape=jax.ShapeDtypeStruct((M, H), _BF16),
        grid=(M // tm, I // ti),
        in_specs=[pl.BlockSpec((tm, H), lambda i, j: (i, 0)),
                  pl.BlockSpec((H, ti), lambda i, j: (0, j)),
                  pl.BlockSpec((1, ti), lambda i, j: (0, j)),
                  pl.BlockSpec((ti, H), lambda i, j: (j, 0)),
                  pl.BlockSpec((1, H), lambda i, j: (0, 0)),
                  pl.BlockSpec((tm, H), lambda i, j: (i, 0)),
                  pl.BlockSpec((1, H), lambda i, j: (0, 0)),
                  pl.BlockSpec((1, H), lambda i, j: (0, 0))],
        out_specs=pl.BlockSpec((tm, H), lambda i, j: (i, 0)),
        scratch_shapes=[pltpu.VMEM((tm, H), jnp.float32)],
        compiler_params=pltpu.CompilerParams(
            dimension_semantics=("parallel", "arbitrary"),
            vmem_limit_bytes=_VMEM_LIMIT),
    )(x, w1, b1.reshape(1, I), w2, b2.reshape(1, H), res,
      gamma.reshape(1, H), beta.reshape(1, H))


def _head_kernel(cls_ref, pw_ref, pb_ref, cw_ref, cb_ref, y_ref,
                 logits_ref, probs_ref, loss_ref):
    pooled = jnp.tanh(
        jnp.dot(cls_ref[...].astype(_BF16), pw_ref[...],
                preferred_element_type=jnp.float32) + pb_ref[...])
    z = jnp.dot(pooled.astype(_BF16), cw_ref[...],
                preferred_element_type=jnp.float32) + cb_ref[...]
    logits_ref[...] = z
    m = jnp.max(z, axis=-1, keepdims=True)
    e = jnp.exp(z - m)
    denom = jnp.sum(e, axis=-1, keepdims=True)
    probs_ref[...] = e / denom
    logp = (z - m) - jnp.log(denom)
    nll = -jnp.sum(y_ref[...] * logp, axis=(0, 1), keepdims=True)
    loss_ref[...] = nll / z.shape[0]


def classifier_head(cls_tok, pool_w, pool_b, cls_w, cls_b, onehot):
    """Fused pooler (tanh-dense) + classifier + softmax / cross-entropy."""
    B, H = cls_tok.shape
    C = cls_w.shape[1]
    logits, probs, loss = pl.pallas_call(
        _head_kernel,
        out_shape=(jax.ShapeDtypeStruct((B, C), jnp.float32),
                   jax.ShapeDtypeStruct((B, C), jnp.float32),
                   jax.ShapeDtypeStruct((1, 1), jnp.float32)),
        compiler_params=pltpu.CompilerParams(vmem_limit_bytes=_VMEM_LIMIT),
    )(cls_tok, pool_w, pool_b.reshape(1, H), cls_w, cls_b.reshape(1, C), onehot)
    return logits, probs, loss


# ----------------------------- model (glue) --------------------------------

def init_params(key, cfg):
    H, I, L = cfg["hidden"], cfg["intermediate"], cfg["layers"]
    std = 0.02

    def normal(k, shape, dtype=jnp.float32):
        return (std * jax.random.normal(k, shape, dtype=jnp.float32)).astype(dtype)

    keys = jax.random.split(key, 4 + L)
    params = {
        "word_emb": normal(keys[0], (cfg["vocab"], H)),
        "pos_emb": normal(keys[1], (cfg["max_pos"], H)),
        "type_emb": normal(keys[2], (cfg["type_vocab"], H)),
        "emb_ln_g": jnp.ones((H,), jnp.float32),
        "emb_ln_b": jnp.zeros((H,), jnp.float32),
        "layers": [],
    }
    for li in range(L):
        lk = jax.random.split(keys[4 + li], 6)
        wq = normal(lk[0], (H, H))
        wk = normal(lk[1], (H, H))
        wv = normal(lk[2], (H, H))
        params["layers"].append({
            # fused QKV weight [H, 3H] stored bf16 (native MXU dtype)
            "w_qkv": jnp.concatenate([wq, wk, wv], axis=1).astype(_BF16),
            "b_qkv": jnp.zeros((3 * H,), jnp.float32),
            "wo": normal(lk[3], (H, H), _BF16),
            "bo": jnp.zeros((H,), jnp.float32),
            "ln1_g": jnp.ones((H,), jnp.float32), "ln1_b": jnp.zeros((H,), jnp.float32),
            "w1": normal(lk[4], (H, I), _BF16), "b1": jnp.zeros((I,), jnp.float32),
            "w2": normal(lk[5], (I, H), _BF16), "b2": jnp.zeros((H,), jnp.float32),
            "ln2_g": jnp.ones((H,), jnp.float32), "ln2_b": jnp.zeros((H,), jnp.float32),
        })
    pk = jax.random.split(keys[3], 2)
    params["pool_w"] = normal(pk[0], (H, H), _BF16)
    params["pool_b"] = jnp.zeros((H,), jnp.float32)
    params["cls_w"] = normal(pk[1], (H, cfg["num_labels"]), _BF16)
    params["cls_b"] = jnp.zeros((cfg["num_labels"],), jnp.float32)
    return params


def robert_forward(params, batch_seqs, batch_seq_masks, batch_seq_segments,
                   labels, cfg):
    """Returns (loss, logits, probabilities) like BertModel.forward (eval mode,
    dropout omitted).  Pretrained-checkpoint loading is replaced by synthetic
    deterministic weights."""
    B, S = batch_seqs.shape
    H, nh = cfg["hidden"], cfg["heads"]
    hd = H // nh
    scale = 1.0 / math.sqrt(hd)
    M = B * S

    # --- embeddings (gather is glue; residual-free LN kernel, bf16 output) ---
    x = (params["word_emb"][batch_seqs]
         + params["pos_emb"][:S][None, :, :]
         + params["type_emb"][batch_seq_segments]).astype(jnp.float32)
    x = layernorm(x.reshape(M, H), params["emb_ln_g"], params["emb_ln_b"])  # bf16

    attn_mask = ((1.0 - batch_seq_masks.astype(jnp.float32)) * -10000.0
                 ).reshape(B, 1, S)

    for layer in params["layers"]:
        # fused QKV projection: one matmul, one read of x, bf16 output
        qkv = dense(x, layer["w_qkv"], layer["b_qkv"])          # (M, 3H) bf16
        # attention (Q/K/V sliced via BlockSpec column blocks of qkv) fused with
        # output projection + residual + LayerNorm
        x = attention_out_ln(qkv.reshape(B, S, 3 * H), attn_mask,
                             x.reshape(B, S, H), layer["wo"], layer["bo"],
                             layer["ln1_g"], layer["ln1_b"],
                             scale, nh).reshape(M, H)
        # fused FFN: gelu(x@w1+b1)@w2 + b2 + residual -> LayerNorm
        x = ffn(x, layer["w1"], layer["b1"], layer["w2"], layer["b2"],
                x, layer["ln2_g"], layer["ln2_b"])

    # --- pooler ([CLS]) + classifier + softmax/xent fused in one kernel ---
    cls_tok = x.reshape(B, S, H)[:, 0, :]
    onehot = jax.nn.one_hot(labels, cfg["num_labels"], dtype=jnp.float32)
    logits, probabilities, loss = classifier_head(
        cls_tok, params["pool_w"], params["pool_b"],
        params["cls_w"], params["cls_b"], onehot)
    return loss[0, 0], logits, probabilities


# --------------------------------- main -------------------------------------

if __name__ == "__main__":
    cfg = dict(vocab=64, max_pos=32, type_vocab=2,
               hidden=128, heads=2, layers=2, intermediate=512, num_labels=2)
    B, S = 2, 8

    key = jax.random.PRNGKey(0)
    k_param, k_ids, k_seg = jax.random.split(key, 3)

    params = init_params(k_param, cfg)

    batch_seqs = jax.random.randint(k_ids, (B, S), 0, cfg["vocab"], dtype=jnp.int32)
    batch_seq_masks = jnp.array([[1, 1, 1, 1, 1, 1, 1, 1],
                                 [1, 1, 1, 1, 1, 0, 0, 0]], dtype=jnp.int32)
    batch_seq_segments = jax.random.randint(k_seg, (B, S), 0, cfg["type_vocab"],
                                            dtype=jnp.int32)
    labels = jnp.array([0, 1], dtype=jnp.int32)

    fwd = jax.jit(functools.partial(robert_forward, cfg=cfg))
    loss, logits, probs = fwd(params, batch_seqs, batch_seq_masks,
                              batch_seq_segments, labels)
    jax.block_until_ready((loss, logits, probs))

    assert logits.shape == (B, cfg["num_labels"])
    assert probs.shape == (B, cfg["num_labels"])
    assert jnp.all(jnp.isfinite(loss)) and jnp.all(jnp.isfinite(probs))
    print("KERNEL_OK")
</pallas_src>

<mosaic_0001>
module attributes {stable_mosaic.version = 11 : i64} {
  func.func @_attn_out_ln_kernel(%arg0: i32, %arg1: i32, %arg2: memref<1x8x128xbf16, #tpu.memory_space<vmem>>, %arg3: memref<1x8x128xbf16, #tpu.memory_space<vmem>>, %arg4: memref<1x8x128xbf16, #tpu.memory_space<vmem>>, %arg5: memref<1x1x8xf32, #tpu.memory_space<vmem>>, %arg6: memref<1x8x128xbf16, #tpu.memory_space<vmem>>, %arg7: memref<128x128xbf16, #tpu.memory_space<vmem>>, %arg8: memref<1x128xf32, #tpu.memory_space<vmem>>, %arg9: memref<1x128xf32, #tpu.memory_space<vmem>>, %arg10: memref<1x128xf32, #tpu.memory_space<vmem>>, %arg11: memref<1x8x128xbf16, #tpu.memory_space<vmem>>) attributes {dimension_semantics = [#tpu.dimension_semantics<parallel>, #tpu.dimension_semantics<parallel>], iteration_bounds = array<i64: 2, 1>, scalar_prefetch = 0 : i64, scratch_operands = 0 : i64, tpu.core_type = #tpu.core_type<tc>, window_params = [{transform_indices = @transform_0, window_bounds = array<i64: 1, 8, 128>}, {transform_indices = @transform_1, window_bounds = array<i64: 1, 8, 128>}, {transform_indices = @transform_2, window_bounds = array<i64: 1, 8, 128>}, {transform_indices = @transform_3, window_bounds = array<i64: 1, 1, 8>}, {transform_indices = @transform_4, window_bounds = array<i64: 1, 8, 128>}, {pipeline_mode = #tpu.pipeline_mode<synchronous>, transform_indices = @transform_5, window_bounds = array<i64: 128, 128>}, {pipeline_mode = #tpu.pipeline_mode<synchronous>, transform_indices = @transform_6, window_bounds = array<i64: 1, 128>}, {pipeline_mode = #tpu.pipeline_mode<synchronous>, transform_indices = @transform_7, window_bounds = array<i64: 1, 128>}, {pipeline_mode = #tpu.pipeline_mode<synchronous>, transform_indices = @transform_8, window_bounds = array<i64: 1, 128>}, {transform_indices = @transform_9, window_bounds = array<i64: 1, 8, 128>}]} {
    %c0 = arith.constant 0 : index
    %c0_0 = arith.constant 0 : index
    %c0_1 = arith.constant 0 : index
    %0 = vector.load %arg2[%c0, %c0_0, %c0_1] : memref<1x8x128xbf16, #tpu.memory_space<vmem>>, vector<1x8x128xbf16>
    %1 = vector.shape_cast %0 : vector<1x8x128xbf16> to vector<8x128xbf16>
    %2 = vector.shape_cast %1 : vector<8x128xbf16> to vector<8x2x64xbf16>
    %3 = tpu.transpose %2, [1, 0, 2] : vector<8x2x64xbf16> -> vector<2x8x64xbf16>
    %c0_2 = arith.constant 0 : index
    %c0_3 = arith.constant 0 : index
    %c0_4 = arith.constant 0 : index
    %4 = vector.load %arg3[%c0_2, %c0_3, %c0_4] : memref<1x8x128xbf16, #tpu.memory_space<vmem>>, vector<1x8x128xbf16>
    %5 = vector.shape_cast %4 : vector<1x8x128xbf16> to vector<8x128xbf16>
    %6 = vector.shape_cast %5 : vector<8x128xbf16> to vector<8x2x64xbf16>
    %7 = tpu.transpose %6, [1, 0, 2] : vector<8x2x64xbf16> -> vector<2x8x64xbf16>
    %c0_5 = arith.constant 0 : index
    %c0_6 = arith.constant 0 : index
    %c0_7 = arith.constant 0 : index
    %8 = vector.load %arg4[%c0_5, %c0_6, %c0_7] : memref<1x8x128xbf16, #tpu.memory_space<vmem>>, vector<1x8x128xbf16>
    %9 = vector.shape_cast %8 : vector<1x8x128xbf16> to vector<8x128xbf16>
    %10 = vector.shape_cast %9 : vector<8x128xbf16> to vector<8x2x64xbf16>
    %11 = tpu.transpose %10, [1, 0, 2] : vector<8x2x64xbf16> -> vector<2x8x64xbf16>
    "tpu.trace_start"() <{level = 10 : i32, message = "hqd,hkd->hqk"}> : () -> ()
    %cst = arith.constant dense<0.000000e+00> : vector<2x8x8xf32>
    %12 = tpu.matmul %3, %7, %cst {dimension_numbers = #tpu.dot_dimension_numbers<[2], [2], [1], [1], [0, 0, 0, 1, 1, 1], [0], [0]>} : vector<2x8x64xbf16>, vector<2x8x64xbf16>, vector<2x8x8xf32> -> vector<2x8x8xf32>
    "tpu.trace_stop"() : () -> ()
    %cst_8 = arith.constant 1.250000e-01 : f32
    %13 = vector.broadcast %cst_8 : f32 to vector<2x8x8xf32>
    %14 = arith.mulf %12, %13 : vector<2x8x8xf32>
    %c0_9 = arith.constant 0 : index
    %c0_10 = arith.constant 0 : index
    %c0_11 = arith.constant 0 : index
    %15 = vector.load %arg5[%c0_9, %c0_10, %c0_11] : memref<1x1x8xf32, #tpu.memory_space<vmem>>, vector<1x1x8xf32>
    %16 = vector.shape_cast %15 : vector<1x1x8xf32> to vector<1x8xf32>
    %17 = vector.shape_cast %16 : vector<1x8xf32> to vector<1x1x8xf32>
    %18 = vector.broadcast %17 : vector<1x1x8xf32> to vector<2x8x8xf32>
    %19 = arith.addf %14, %18 : vector<2x8x8xf32>
    %cst_12 = arith.constant dense<0xFF800000> : vector<2x8xf32>
    %20 = vector.multi_reduction <maximumf>, %19, %cst_12 [2] : vector<2x8x8xf32> to vector<2x8xf32>
    %21 = vector.shape_cast %20 : vector<2x8xf32> to vector<2x8x1xf32>
    %22 = vector.broadcast %21 : vector<2x8x1xf32> to vector<2x8x8xf32>
    %23 = arith.subf %19, %22 : vector<2x8x8xf32>
    %24 = math.exp %23 : vector<2x8x8xf32>
    %cst_13 = arith.constant dense<0.000000e+00> : vector<2x8xf32>
    %25 = vector.multi_reduction <add>, %24, %cst_13 [2] : vector<2x8x8xf32> to vector<2x8xf32>
    %26 = vector.shape_cast %25 : vector<2x8xf32> to vector<2x8x1xf32>
    %27 = tpu.reciprocal %26 {approx = true} : vector<2x8x1xf32> -> vector<2x8x1xf32>
    %28 = vector.broadcast %27 : vector<2x8x1xf32> to vector<2x8x8xf32>
    %29 = arith.mulf %24, %28 : vector<2x8x8xf32>
    %30 = arith.truncf %29 : vector<2x8x8xf32> to vector<2x8x8xbf16>
    "tpu.trace_start"() <{level = 10 : i32, message = "hqk,hkd->hqd"}> : () -> ()
    %cst_14 = arith.constant dense<0.000000e+00> : vector<2x8x64xf32>
    %31 = tpu.matmul %30, %11, %cst_14 {dimension_numbers = #tpu.dot_dimension_numbers<[2], [1], [1], [2], [0, 0, 0, 1, 1, 2], [0], [0]>} : vector<2x8x8xbf16>, vector<2x8x64xbf16>, vector<2x8x64xf32> -> vector<2x8x64xf32>
    "tpu.trace_stop"() : () -> ()
    %32 = tpu.transpose %31, [1, 0, 2] : vector<2x8x64xf32> -> vector<8x2x64xf32>
    %33 = vector.shape_cast %32 : vector<8x2x64xf32> to vector<8x128xf32>
    %34 = arith.truncf %33 : vector<8x128xf32> to vector<8x128xbf16>
    %c0_15 = arith.constant 0 : index
    %c0_16 = arith.constant 0 : index
    %35 = vector.load %arg7[%c0_15, %c0_16] : memref<128x128xbf16, #tpu.memory_space<vmem>>, vector<128x128xbf16>
    %cst_17 = arith.constant dense<0.000000e+00> : vector<8x128xf32>
    %36 = tpu.matmul %34, %35, %cst_17 {dimension_numbers = #tpu.dot_dimension_numbers<[1], [0], [0], [1], [0, 0, 1, 1], [], []>} : vector<8x128xbf16>, vector<128x128xbf16>, vector<8x128xf32> -> vector<8x128xf32>
    %c0_18 = arith.constant 0 : index
    %c0_19 = arith.constant 0 : index
    %37 = vector.load %arg8[%c0_18, %c0_19] : memref<1x128xf32, #tpu.memory_space<vmem>>, vector<1x128xf32>
    %38 = vector.broadcast %37 : vector<1x128xf32> to vector<8x128xf32>
    %39 = arith.addf %36, %38 : vector<8x128xf32>
    %c0_20 = arith.constant 0 : index
    %c0_21 = arith.constant 0 : index
    %c0_22 = arith.constant 0 : index
    %40 = vector.load %arg6[%c0_20, %c0_21, %c0_22] : memref<1x8x128xbf16, #tpu.memory_space<vmem>>, vector<1x8x128xbf16>
    %41 = vector.shape_cast %40 : vector<1x8x128xbf16> to vector<8x128xbf16>
    %42 = arith.extf %41 : vector<8x128xbf16> to vector<8x128xf32>
    %43 = arith.addf %39, %42 : vector<8x128xf32>
    %c0_23 = arith.constant 0 : index
    %c0_24 = arith.constant 0 : index
    %44 = vector.load %arg9[%c0_23, %c0_24] : memref<1x128xf32, #tpu.memory_space<vmem>>, vector<1x128xf32>
    %c0_25 = arith.constant 0 : index
    %c0_26 = arith.constant 0 : index
    %45 = vector.load %arg10[%c0_25, %c0_26] : memref<1x128xf32, #tpu.memory_space<vmem>>, vector<1x128xf32>
    %cst_27 = arith.constant dense<0.000000e+00> : vector<8xf32>
    %46 = vector.multi_reduction <add>, %43, %cst_27 [1] : vector<8x128xf32> to vector<8xf32>
    %47 = vector.shape_cast %46 : vector<8xf32> to vector<8x1xf32>
    %cst_28 = arith.constant 1.280000e+02 : f32
    %48 = vector.broadcast %cst_28 : f32 to vector<8x1xf32>
    %49 = arith.divf %47, %48 : vector<8x1xf32>
    %50 = vector.broadcast %49 : vector<8x1xf32> to vector<8x128xf32>
    %51 = arith.subf %43, %50 : vector<8x128xf32>
    %52 = arith.mulf %51, %51 : vector<8x128xf32>
    %cst_29 = arith.constant dense<0.000000e+00> : vector<8xf32>
    %53 = vector.multi_reduction <add>, %52, %cst_29 [1] : vector<8x128xf32> to vector<8xf32>
    %54 = vector.shape_cast %53 : vector<8xf32> to vector<8x1xf32>
    %cst_30 = arith.constant 1.280000e+02 : f32
    %55 = vector.broadcast %cst_30 : f32 to vector<8x1xf32>
    %56 = arith.divf %54, %55 : vector<8x1xf32>
    %57 = vector.broadcast %49 : vector<8x1xf32> to vector<8x128xf32>
    %58 = arith.subf %43, %57 : vector<8x128xf32>
    %cst_31 = arith.constant 9.99999996E-13 : f32
    %59 = vector.broadcast %cst_31 : f32 to vector<8x1xf32>
    %60 = arith.addf %56, %59 : vector<8x1xf32>
    %61 = math.rsqrt %60 : vector<8x1xf32>
    %62 = vector.broadcast %61 : vector<8x1xf32> to vector<8x128xf32>
    %63 = arith.mulf %58, %62 : vector<8x128xf32>
    %64 = vector.broadcast %44 : vector<1x128xf32> to vector<8x128xf32>
    %65 = arith.mulf %63, %64 : vector<8x128xf32>
    %66 = vector.broadcast %45 : vector<1x128xf32> to vector<8x128xf32>
    %67 = arith.addf %65, %66 : vector<8x128xf32>
    %68 = arith.truncf %67 : vector<8x128xf32> to vector<8x128xbf16>
    %c0_32 = arith.constant 0 : index
    %c0_33 = arith.constant 0 : index
    %c0_34 = arith.constant 0 : index
    %69 = vector.load %arg11[%c0_32, %c0_33, %c0_34] : memref<1x8x128xbf16, #tpu.memory_space<vmem>>, vector<1x8x128xbf16>
    %70 = vector.shape_cast %69 : vector<1x8x128xbf16> to vector<8x128xbf16>
    %71 = vector.shape_cast %68 : vector<8x128xbf16> to vector<1x8x128xbf16>
    tpu.vector_store %arg11[%c0_32, %c0_33, %c0_34], %71 {strides = array<i32>} : memref<1x8x128xbf16, #tpu.memory_space<vmem>>, vector<1x8x128xbf16>,
    return
  }
  func.func @transform_0(%arg0: i32, %arg1: i32) -> (i32, i32, i32) {
    %c0_i32 = arith.constant 0 : i32
    %c0_i32_0 = arith.constant 0 : i32
    return %arg0, %arg1, %c0_i32 : i32, i32, i32
  }
  func.func @transform_1(%arg0: i32, %arg1: i32) -> (i32, i32, i32) {
    %c0_i32 = arith.constant 0 : i32
    %c1_i32 = arith.constant 1 : i32
    %c0_i32_0 = arith.constant 0 : i32
    return %arg0, %c0_i32, %c1_i32 : i32, i32, i32
  }
  func.func @transform_2(%arg0: i32, %arg1: i32) -> (i32, i32, i32) {
    %c0_i32 = arith.constant 0 : i32
    %c2_i32 = arith.constant 2 : i32
    %c0_i32_0 = arith.constant 0 : i32
    return %arg0, %c0_i32, %c2_i32 : i32, i32, i32
  }
  func.func @transform_3(%arg0: i32, %arg1: i32) -> (i32, i32, i32) {
    %c0_i32 = arith.constant 0 : i32
    %c0_i32_0 = arith.constant 0 : i32
    %c0_i32_1 = arith.constant 0 : i32
    return %arg0, %c0_i32, %c0_i32_0 : i32, i32, i32
  }
  func.func @transform_4(%arg0: i32, %arg1: i32) -> (i32, i32, i32) {
    %c0_i32 = arith.constant 0 : i32
    %c0_i32_0 = arith.constant 0 : i32
    return %arg0, %arg1, %c0_i32 : i32, i32, i32
  }
  func.func @transform_5(%arg0: i32, %arg1: i32) -> (i32, i32) {
    %c0_i32 = arith.constant 0 : i32
    %c0_i32_0 = arith.constant 0 : i32
    %c0_i32_1 = arith.constant 0 : i32
    return %c0_i32, %c0_i32_0 : i32, i32
  }
  func.func @transform_6(%arg0: i32, %arg1: i32) -> (i32, i32) {
    %c0_i32 = arith.constant 0 : i32
    %c0_i32_0 = arith.constant 0 : i32
    %c0_i32_1 = arith.constant 0 : i32
    return %c0_i32, %c0_i32_0 : i32, i32
  }
  func.func @transform_7(%arg0: i32, %arg1: i32) -> (i32, i32) {
    %c0_i32 = arith.constant 0 : i32
    %c0_i32_0 = arith.constant 0 : i32
    %c0_i32_1 = arith.constant 0 : i32
    return %c0_i32, %c0_i32_0 : i32, i32
  }
  func.func @transform_8(%arg0: i32, %arg1: i32) -> (i32, i32) {
    %c0_i32 = arith.constant 0 : i32
    %c0_i32_0 = arith.constant 0 : i32
    %c0_i32_1 = arith.constant 0 : i32
    return %c0_i32, %c0_i32_0 : i32, i32
  }
  func.func @transform_9(%arg0: i32, %arg1: i32) -> (i32, i32, i32) {
    %c0_i32 = arith.constant 0 : i32
    %c0_i32_0 = arith.constant 0 : i32
    return %arg0, %arg1, %c0_i32 : i32, i32, i32
  }
}

module attributes {stable_mosaic.version = 11 : i64} {
  func.func @_dense_kernel(%arg0: i32, %arg1: memref<16x128xbf16, #tpu.memory_space<vmem>>, %arg2: memref<128x384xbf16, #tpu.memory_space<vmem>>, %arg3: memref<1x384xf32, #tpu.memory_space<vmem>>, %arg4: memref<16x384xbf16, #tpu.memory_space<vmem>>) attributes {dimension_semantics = [#tpu.dimension_semantics<parallel>], iteration_bounds = array<i64: 1>, scalar_prefetch = 0 : i64, scratch_operands = 0 : i64, tpu.core_type = #tpu.core_type<tc>, window_params = [{transform_indices = @transform_0, window_bounds = array<i64: 16, 128>}, {pipeline_mode = #tpu.pipeline_mode<synchronous>, transform_indices = @transform_1, window_bounds = array<i64: 128, 384>}, {pipeline_mode = #tpu.pipeline_mode<synchronous>, transform_indices = @transform_2, window_bounds = array<i64: 1, 384>}, {transform_indices = @transform_3, window_bounds = array<i64: 16, 384>}]} {
    %c0 = arith.constant 0 : index
    %c0_0 = arith.constant 0 : index
    %0 = vector.load %arg1[%c0, %c0_0] : memref<16x128xbf16, #tpu.memory_space<vmem>>, vector<16x128xbf16>
    %c0_1 = arith.constant 0 : index
    %c0_2 = arith.constant 0 : index
    %1 = vector.load %arg2[%c0_1, %c0_2] : memref<128x384xbf16, #tpu.memory_space<vmem>>, vector<128x384xbf16>
    %cst = arith.constant dense<0.000000e+00> : vector<16x384xf32>
    %2 = tpu.matmul %0, %1, %cst {dimension_numbers = #tpu.dot_dimension_numbers<[1], [0], [0], [1], [0, 0, 1, 1], [], []>} : vector<16x128xbf16>, vector<128x384xbf16>, vector<16x384xf32> -> vector<16x384xf32>
    %c0_3 = arith.constant 0 : index
    %c0_4 = arith.constant 0 : index
    %3 = vector.load %arg3[%c0_3, %c0_4] : memref<1x384xf32, #tpu.memory_space<vmem>>, vector<1x384xf32>
    %4 = vector.broadcast %3 : vector<1x384xf32> to vector<16x384xf32>
    %5 = arith.addf %2, %4 : vector<16x384xf32>
    %6 = arith.truncf %5 : vector<16x384xf32> to vector<16x384xbf16>
    %c0_5 = arith.constant 0 : index
    %c0_6 = arith.constant 0 : index
    %7 = vector.load %arg4[%c0_5, %c0_6] : memref<16x384xbf16, #tpu.memory_space<vmem>>, vector<16x384xbf16>
    tpu.vector_store %arg4[%c0_5, %c0_6], %6 {strides = array<i32>} : memref<16x384xbf16, #tpu.memory_space<vmem>>, vector<16x384xbf16>,
    return
  }
  func.func @transform_0(%arg0: i32) -> (i32, i32) {
    %c0_i32 = arith.constant 0 : i32
    %c0_i32_0 = arith.constant 0 : i32
    return %arg0, %c0_i32 : i32, i32
  }
  func.func @transform_1(%arg0: i32) -> (i32, i32) {
    %c0_i32 = arith.constant 0 : i32
    %c0_i32_0 = arith.constant 0 : i32
    %c0_i32_1 = arith.constant 0 : i32
    return %c0_i32, %c0_i32_0 : i32, i32
  }
  func.func @transform_2(%arg0: i32) -> (i32, i32) {
    %c0_i32 = arith.constant 0 : i32
    %c0_i32_0 = arith.constant 0 : i32
    %c0_i32_1 = arith.constant 0 : i32
    return %c0_i32, %c0_i32_0 : i32, i32
  }
  func.func @transform_3(%arg0: i32) -> (i32, i32) {
    %c0_i32 = arith.constant 0 : i32
    %c0_i32_0 = arith.constant 0 : i32
    return %arg0, %c0_i32 : i32, i32
  }
}

module attributes {stable_mosaic.version = 11 : i64} {
  func.func @_ln_kernel(%arg0: i32, %arg1: memref<16x128xf32, #tpu.memory_space<vmem>>, %arg2: memref<1x128xf32, #tpu.memory_space<vmem>>, %arg3: memref<1x128xf32, #tpu.memory_space<vmem>>, %arg4: memref<16x128xbf16, #tpu.memory_space<vmem>>) attributes {dimension_semantics = [#tpu.dimension_semantics<parallel>], iteration_bounds = array<i64: 1>, scalar_prefetch = 0 : i64, scratch_operands = 0 : i64, tpu.core_type = #tpu.core_type<tc>, window_params = [{transform_indices = @transform_0, window_bounds = array<i64: 16, 128>}, {pipeline_mode = #tpu.pipeline_mode<synchronous>, transform_indices = @transform_1, window_bounds = array<i64: 1, 128>}, {pipeline_mode = #tpu.pipeline_mode<synchronous>, transform_indices = @transform_2, window_bounds = array<i64: 1, 128>}, {transform_indices = @transform_3, window_bounds = array<i64: 16, 128>}]} {
    %c0 = arith.constant 0 : index
    %c0_0 = arith.constant 0 : index
    %0 = vector.load %arg1[%c0, %c0_0] : memref<16x128xf32, #tpu.memory_space<vmem>>, vector<16x128xf32>
    %c0_1 = arith.constant 0 : index
    %c0_2 = arith.constant 0 : index
    %1 = vector.load %arg2[%c0_1, %c0_2] : memref<1x128xf32, #tpu.memory_space<vmem>>, vector<1x128xf32>
    %c0_3 = arith.constant 0 : index
    %c0_4 = arith.constant 0 : index
    %2 = vector.load %arg3[%c0_3, %c0_4] : memref<1x128xf32, #tpu.memory_space<vmem>>, vector<1x128xf32>
    %cst = arith.constant dense<0.000000e+00> : vector<16xf32>
    %3 = vector.multi_reduction <add>, %0, %cst [1] : vector<16x128xf32> to vector<16xf32>
    %4 = vector.shape_cast %3 : vector<16xf32> to vector<16x1xf32>
    %cst_5 = arith.constant 1.280000e+02 : f32
    %5 = vector.broadcast %cst_5 : f32 to vector<16x1xf32>
    %6 = arith.divf %4, %5 : vector<16x1xf32>
    %7 = vector.broadcast %6 : vector<16x1xf32> to vector<16x128xf32>
    %8 = arith.subf %0, %7 : vector<16x128xf32>
    %9 = arith.mulf %8, %8 : vector<16x128xf32>
    %cst_6 = arith.constant dense<0.000000e+00> : vector<16xf32>
    %10 = vector.multi_reduction <add>, %9, %cst_6 [1] : vector<16x128xf32> to vector<16xf32>
    %11 = vector.shape_cast %10 : vector<16xf32> to vector<16x1xf32>
    %cst_7 = arith.constant 1.280000e+02 : f32
    %12 = vector.broadcast %cst_7 : f32 to vector<16x1xf32>
    %13 = arith.divf %11, %12 : vector<16x1xf32>
    %14 = vector.broadcast %6 : vector<16x1xf32> to vector<16x128xf32>
    %15 = arith.subf %0, %14 : vector<16x128xf32>
    %cst_8 = arith.constant 9.99999996E-13 : f32
    %16 = vector.broadcast %cst_8 : f32 to vector<16x1xf32>
    %17 = arith.addf %13, %16 : vector<16x1xf32>
    %18 = math.rsqrt %17 : vector<16x1xf32>
    %19 = vector.broadcast %18 : vector<16x1xf32> to vector<16x128xf32>
    %20 = arith.mulf %15, %19 : vector<16x128xf32>
    %21 = vector.broadcast %1 : vector<1x128xf32> to vector<16x128xf32>
    %22 = arith.mulf %20, %21 : vector<16x128xf32>
    %23 = vector.broadcast %2 : vector<1x128xf32> to vector<16x128xf32>
    %24 = arith.addf %22, %23 : vector<16x128xf32>
    %25 = arith.truncf %24 : vector<16x128xf32> to vector<16x128xbf16>
    %c0_9 = arith.constant 0 : index
    %c0_10 = arith.constant 0 : index
    %26 = vector.load %arg4[%c0_9, %c0_10] : memref<16x128xbf16, #tpu.memory_space<vmem>>, vector<16x128xbf16>
    tpu.vector_store %arg4[%c0_9, %c0_10], %25 {strides = array<i32>} : memref<16x128xbf16, #tpu.memory_space<vmem>>, vector<16x128xbf16>,
    return
  }
  func.func @transform_0(%arg0: i32) -> (i32, i32) {
    %c0_i32 = arith.constant 0 : i32
    %c0_i32_0 = arith.constant 0 : i32
    return %arg0, %c0_i32 : i32, i32
  }
  func.func @transform_1(%arg0: i32) -> (i32, i32) {
    %c0_i32 = arith.constant 0 : i32
    %c0_i32_0 = arith.constant 0 : i32
    %c0_i32_1 = arith.constant 0 : i32
    return %c0_i32, %c0_i32_0 : i32, i32
  }
  func.func @transform_2(%arg0: i32) -> (i32, i32) {
    %c0_i32 = arith.constant 0 : i32
    %c0_i32_0 = arith.constant 0 : i32
    %c0_i32_1 = arith.constant 0 : i32
    return %c0_i32, %c0_i32_0 : i32, i32
  }
  func.func @transform_3(%arg0: i32) -> (i32, i32) {
    %c0_i32 = arith.constant 0 : i32
    %c0_i32_0 = arith.constant 0 : i32
    return %arg0, %c0_i32 : i32, i32
  }
}

module attributes {stable_mosaic.version = 11 : i64} {
  func.func @_ffn_kernel(%arg0: i32, %arg1: i32, %arg2: memref<16x128xbf16, #tpu.memory_space<vmem>>, %arg3: memref<128x512xbf16, #tpu.memory_space<vmem>>, %arg4: memref<1x512xf32, #tpu.memory_space<vmem>>, %arg5: memref<512x128xbf16, #tpu.memory_space<vmem>>, %arg6: memref<1x128xf32, #tpu.memory_space<vmem>>, %arg7: memref<16x128xbf16, #tpu.memory_space<vmem>>, %arg8: memref<1x128xf32, #tpu.memory_space<vmem>>, %arg9: memref<1x128xf32, #tpu.memory_space<vmem>>, %arg10: memref<16x128xbf16, #tpu.memory_space<vmem>>, %arg11: memref<16x128xf32, #tpu.memory_space<vmem>>) attributes {dimension_semantics = [#tpu.dimension_semantics<parallel>, #tpu.dimension_semantics<arbitrary>], iteration_bounds = array<i64: 1, 1>, scalar_prefetch = 0 : i64, scratch_operands = 1 : i64, tpu.core_type = #tpu.core_type<tc>, window_params = [{transform_indices = @transform_0, window_bounds = array<i64: 16, 128>}, {transform_indices = @transform_1, window_bounds = array<i64: 128, 512>}, {transform_indices = @transform_2, window_bounds = array<i64: 1, 512>}, {transform_indices = @transform_3, window_bounds = array<i64: 512, 128>}, {pipeline_mode = #tpu.pipeline_mode<synchronous>, transform_indices = @transform_4, window_bounds = array<i64: 1, 128>}, {transform_indices = @transform_5, window_bounds = array<i64: 16, 128>}, {pipeline_mode = #tpu.pipeline_mode<synchronous>, transform_indices = @transform_6, window_bounds = array<i64: 1, 128>}, {pipeline_mode = #tpu.pipeline_mode<synchronous>, transform_indices = @transform_7, window_bounds = array<i64: 1, 128>}, {transform_indices = @transform_8, window_bounds = array<i64: 16, 128>}]} {
    %c0_i32 = arith.constant 0 : i32
    %0 = arith.cmpi eq, %arg1, %c0_i32 : i32
    %1 = arith.extui %0 : i1 to i32
    %c0_i32_0 = arith.constant 0 : i32
    %2 = arith.cmpi ne, %1, %c0_i32_0 : i32
    scf.if %2 {
      %cst_19 = arith.constant 0.000000e+00 : f32
      %31 = vector.broadcast %cst_19 : f32 to vector<16x128xf32>
      %c0_20 = arith.constant 0 : index
      %c0_21 = arith.constant 0 : index
      %32 = vector.load %arg11[%c0_20, %c0_21] : memref<16x128xf32, #tpu.memory_space<vmem>>, vector<16x128xf32>
      tpu.vector_store %arg11[%c0_20, %c0_21], %31 {strides = array<i32>} : memref<16x128xf32, #tpu.memory_space<vmem>>, vector<16x128xf32>,
    } else {
    }
    %c0 = arith.constant 0 : index
    %c0_1 = arith.constant 0 : index
    %3 = vector.load %arg2[%c0, %c0_1] : memref<16x128xbf16, #tpu.memory_space<vmem>>, vector<16x128xbf16>
    %c0_2 = arith.constant 0 : index
    %c0_3 = arith.constant 0 : index
    %4 = vector.load %arg3[%c0_2, %c0_3] : memref<128x512xbf16, #tpu.memory_space<vmem>>, vector<128x512xbf16>
    %cst = arith.constant dense<0.000000e+00> : vector<16x512xf32>
    %5 = tpu.matmul %3, %4, %cst {dimension_numbers = #tpu.dot_dimension_numbers<[1], [0], [0], [1], [0, 0, 1, 1], [], []>} : vector<16x128xbf16>, vector<128x512xbf16>, vector<16x512xf32> -> vector<16x512xf32>
    %c0_4 = arith.constant 0 : index
    %c0_5 = arith.constant 0 : index
    %6 = vector.load %arg4[%c0_4, %c0_5] : memref<1x512xf32, #tpu.memory_space<vmem>>, vector<1x512xf32>
    %7 = vector.broadcast %6 : vector<1x512xf32> to vector<16x512xf32>
    %8 = arith.addf %5, %7 : vector<16x512xf32>
    %cst_6 = arith.constant 5.000000e-01 : f32
    %9 = vector.broadcast %cst_6 : f32 to vector<16x512xf32>
    %10 = arith.mulf %9, %8 : vector<16x512xf32>
    %cst_7 = arith.constant 4.471500e-02 : f32
    %11 = vector.broadcast %cst_7 : f32 to vector<16x512xf32>
    %12 = arith.mulf %11, %8 : vector<16x512xf32>
    %13 = arith.mulf %12, %8 : vector<16x512xf32>
    %14 = arith.mulf %13, %8 : vector<16x512xf32>
    %15 = arith.addf %8, %14 : vector<16x512xf32>
    %cst_8 = arith.constant 0.797884583 : f32
    %16 = vector.broadcast %cst_8 : f32 to vector<16x512xf32>
    %17 = arith.mulf %16, %15 : vector<16x512xf32>
    %18 = math.tanh %17 : vector<16x512xf32>
    %cst_9 = arith.constant 1.000000e+00 : f32
    %19 = vector.broadcast %cst_9 : f32 to vector<16x512xf32>
    %20 = arith.addf %19, %18 : vector<16x512xf32>
    %21 = arith.mulf %10, %20 : vector<16x512xf32>
    %c0_10 = arith.constant 0 : index
    %c0_11 = arith.constant 0 : index
    %22 = vector.load %arg11[%c0_10, %c0_11] : memref<16x128xf32, #tpu.memory_space<vmem>>, vector<16x128xf32>
    %23 = arith.truncf %21 : vector<16x512xf32> to vector<16x512xbf16>
    %c0_12 = arith.constant 0 : index
    %c0_13 = arith.constant 0 : index
    %24 = vector.load %arg5[%c0_12, %c0_13] : memref<512x128xbf16, #tpu.memory_space<vmem>>, vector<512x128xbf16>
    %cst_14 = arith.constant dense<0.000000e+00> : vector<16x128xf32>
    %25 = tpu.matmul %23, %24, %cst_14 {dimension_numbers = #tpu.dot_dimension_numbers<[1], [0], [0], [1], [0, 0, 1, 1], [], []>} : vector<16x512xbf16>, vector<512x128xbf16>, vector<16x128xf32> -> vector<16x128xf32>
    %26 = arith.addf %22, %25 : vector<16x128xf32>
    %c0_15 = arith.constant 0 : index
    %c0_16 = arith.constant 0 : index
    %27 = vector.load %arg11[%c0_15, %c0_16] : memref<16x128xf32, #tpu.memory_space<vmem>>, vector<16x128xf32>
    tpu.vector_store %arg11[%c0_15, %c0_16], %26 {strides = array<i32>} : memref<16x128xf32, #tpu.memory_space<vmem>>, vector<16x128xf32>,
    %c0_i32_17 = arith.constant 0 : i32
    %28 = arith.cmpi eq, %arg1, %c0_i32_17 : i32
    %29 = arith.extui %28 : i1 to i32
    %c0_i32_18 = arith.constant 0 : i32
    %30 = arith.cmpi ne, %29, %c0_i32_18 : i32
    scf.if %30 {
      %c0_19 = arith.constant 0 : index
      %c0_20 = arith.constant 0 : index
      %31 = vector.load %arg11[%c0_19, %c0_20] : memref<16x128xf32, #tpu.memory_space<vmem>>, vector<16x128xf32>
      %c0_21 = arith.constant 0 : index
      %c0_22 = arith.constant 0 : index
      %32 = vector.load %arg6[%c0_21, %c0_22] : memref<1x128xf32, #tpu.memory_space<vmem>>, vector<1x128xf32>
      %33 = vector.broadcast %32 : vector<1x128xf32> to vector<16x128xf32>
      %34 = arith.addf %31, %33 : vector<16x128xf32>
      %c0_23 = arith.constant 0 : index
      %c0_24 = arith.constant 0 : index
      %35 = vector.load %arg7[%c0_23, %c0_24] : memref<16x128xbf16, #tpu.memory_space<vmem>>, vector<16x128xbf16>
      %36 = arith.extf %35 : vector<16x128xbf16> to vector<16x128xf32>
      %37 = arith.addf %34, %36 : vector<16x128xf32>
      %c0_25 = arith.constant 0 : index
      %c0_26 = arith.constant 0 : index
      %38 = vector.load %arg8[%c0_25, %c0_26] : memref<1x128xf32, #tpu.memory_space<vmem>>, vector<1x128xf32>
      %c0_27 = arith.constant 0 : index
      %c0_28 = arith.constant 0 : index
      %39 = vector.load %arg9[%c0_27, %c0_28] : memref<1x128xf32, #tpu.memory_space<vmem>>, vector<1x128xf32>
      %cst_29 = arith.constant dense<0.000000e+00> : vector<16xf32>
      %40 = vector.multi_reduction <add>, %37, %cst_29 [1] : vector<16x128xf32> to vector<16xf32>
      %41 = vector.shape_cast %40 : vector<16xf32> to vector<16x1xf32>
      %cst_30 = arith.constant 1.280000e+02 : f32
      %42 = vector.broadcast %cst_30 : f32 to vector<16x1xf32>
      %43 = arith.divf %41, %42 : vector<16x1xf32>
      %44 = vector.broadcast %43 : vector<16x1xf32> to vector<16x128xf32>
      %45 = arith.subf %37, %44 : vector<16x128xf32>
      %46 = arith.mulf %45, %45 : vector<16x128xf32>
      %cst_31 = arith.constant dense<0.000000e+00> : vector<16xf32>
      %47 = vector.multi_reduction <add>, %46, %cst_31 [1] : vector<16x128xf32> to vector<16xf32>
      %48 = vector.shape_cast %47 : vector<16xf32> to vector<16x1xf32>
      %cst_32 = arith.constant 1.280000e+02 : f32
      %49 = vector.broadcast %cst_32 : f32 to vector<16x1xf32>
      %50 = arith.divf %48, %49 : vector<16x1xf32>
      %51 = vector.broadcast %43 : vector<16x1xf32> to vector<16x128xf32>
      %52 = arith.subf %37, %51 : vector<16x128xf32>
      %cst_33 = arith.constant 9.99999996E-13 : f32
      %53 = vector.broadcast %cst_33 : f32 to vector<16x1xf32>
      %54 = arith.addf %50, %53 : vector<16x1xf32>
      %55 = math.rsqrt %54 : vector<16x1xf32>
      %56 = vector.broadcast %55 : vector<16x1xf32> to vector<16x128xf32>
      %57 = arith.mulf %52, %56 : vector<16x128xf32>
      %58 = vector.broadcast %38 : vector<1x128xf32> to vector<16x128xf32>
      %59 = arith.mulf %57, %58 : vector<16x128xf32>
      %60 = vector.broadcast %39 : vector<1x128xf32> to vector<16x128xf32>
      %61 = arith.addf %59, %60 : vector<16x128xf32>
      %62 = arith.truncf %61 : vector<16x128xf32> to vector<16x128xbf16>
      %c0_34 = arith.constant 0 : index
      %c0_35 = arith.constant 0 : index
      %63 = vector.load %arg10[%c0_34, %c0_35] : memref<16x128xbf16, #tpu.memory_space<vmem>>, vector<16x128xbf16>
      tpu.vector_store %arg10[%c0_34, %c0_35], %62 {strides = array<i32>} : memref<16x128xbf16, #tpu.memory_space<vmem>>, vector<16x128xbf16>,
    } else {
    }
    return
  }
  func.func @transform_0(%arg0: i32, %arg1: i32) -> (i32, i32) {
    %c0_i32 = arith.constant 0 : i32
    %c0_i32_0 = arith.constant 0 : i32
    return %arg0, %c0_i32 : i32, i32
  }
  func.func @transform_1(%arg0: i32, %arg1: i32) -> (i32, i32) {
    %c0_i32 = arith.constant 0 : i32
    %c0_i32_0 = arith.constant 0 : i32
    return %c0_i32, %arg1 : i32, i32
  }
  func.func @transform_2(%arg0: i32, %arg1: i32) -> (i32, i32) {
    %c0_i32 = arith.constant 0 : i32
    %c0_i32_0 = arith.constant 0 : i32
    return %c0_i32, %arg1 : i32, i32
  }
  func.func @transform_3(%arg0: i32, %arg1: i32) -> (i32, i32) {
    %c0_i32 = arith.constant 0 : i32
    %c0_i32_0 = arith.constant 0 : i32
    return %arg1, %c0_i32 : i32, i32
  }
  func.func @transform_4(%arg0: i32, %arg1: i32) -> (i32, i32) {
    %c0_i32 = arith.constant 0 : i32
    %c0_i32_0 = arith.constant 0 : i32
    %c0_i32_1 = arith.constant 0 : i32
    return %c0_i32, %c0_i32_0 : i32, i32
  }
  func.func @transform_5(%arg0: i32, %arg1: i32) -> (i32, i32) {
    %c0_i32 = arith.constant 0 : i32
    %c0_i32_0 = arith.constant 0 : i32
    return %arg0, %c0_i32 : i32, i32
  }
  func.func @transform_6(%arg0: i32, %arg1: i32) -> (i32, i32) {
    %c0_i32 = arith.constant 0 : i32
    %c0_i32_0 = arith.constant 0 : i32
    %c0_i32_1 = arith.constant 0 : i32
    return %c0_i32, %c0_i32_0 : i32, i32
  }
  func.func @transform_7(%arg0: i32, %arg1: i32) -> (i32, i32) {
    %c0_i32 = arith.constant 0 : i32
    %c0_i32_0 = arith.constant 0 : i32
    %c0_i32_1 = arith.constant 0 : i32
    return %c0_i32, %c0_i32_0 : i32, i32
  }
  func.func @transform_8(%arg0: i32, %arg1: i32) -> (i32, i32) {
    %c0_i32 = arith.constant 0 : i32
    %c0_i32_0 = arith.constant 0 : i32
    return %arg0, %c0_i32 : i32, i32
  }
}

module attributes {stable_mosaic.version = 11 : i64} {
  func.func @_head_kernel(%arg0: memref<2x128xbf16, #tpu.memory_space<vmem>>, %arg1: memref<128x128xbf16, #tpu.memory_space<vmem>>, %arg2: memref<1x128xf32, #tpu.memory_space<vmem>>, %arg3: memref<128x2xbf16, #tpu.memory_space<vmem>>, %arg4: memref<1x2xf32, #tpu.memory_space<vmem>>, %arg5: memref<2x2xf32, #tpu.memory_space<vmem>>, %arg6: memref<2x2xf32, #tpu.memory_space<vmem>>, %arg7: memref<2x2xf32, #tpu.memory_space<vmem>>, %arg8: memref<1x1xf32, #tpu.memory_space<vmem>>) attributes {dimension_semantics = [], scalar_prefetch = 0 : i64, scratch_operands = 0 : i64, tpu.core_type = #tpu.core_type<tc>} {
    %c0 = arith.constant 0 : index
    %c0_0 = arith.constant 0 : index
    %0 = vector.load %arg0[%c0, %c0_0] : memref<2x128xbf16, #tpu.memory_space<vmem>>, vector<2x128xbf16>
    %c0_1 = arith.constant 0 : index
    %c0_2 = arith.constant 0 : index
    %1 = vector.load %arg1[%c0_1, %c0_2] : memref<128x128xbf16, #tpu.memory_space<vmem>>, vector<128x128xbf16>
    %cst = arith.constant dense<0.000000e+00> : vector<2x128xf32>
    %2 = tpu.matmul %0, %1, %cst {dimension_numbers = #tpu.dot_dimension_numbers<[1], [0], [0], [1], [0, 0, 1, 1], [], []>} : vector<2x128xbf16>, vector<128x128xbf16>, vector<2x128xf32> -> vector<2x128xf32>
    %c0_3 = arith.constant 0 : index
    %c0_4 = arith.constant 0 : index
    %3 = vector.load %arg2[%c0_3, %c0_4] : memref<1x128xf32, #tpu.memory_space<vmem>>, vector<1x128xf32>
    %4 = vector.broadcast %3 : vector<1x128xf32> to vector<2x128xf32>
    %5 = arith.addf %2, %4 : vector<2x128xf32>
    %6 = math.tanh %5 : vector<2x128xf32>
    %7 = arith.truncf %6 : vector<2x128xf32> to vector<2x128xbf16>
    %c0_5 = arith.constant 0 : index
    %c0_6 = arith.constant 0 : index
    %8 = vector.load %arg3[%c0_5, %c0_6] : memref<128x2xbf16, #tpu.memory_space<vmem>>, vector<128x2xbf16>
    %cst_7 = arith.constant dense<0.000000e+00> : vector<2x2xf32>
    %9 = tpu.matmul %7, %8, %cst_7 {dimension_numbers = #tpu.dot_dimension_numbers<[1], [0], [0], [1], [0, 0, 1, 1], [], []>} : vector<2x128xbf16>, vector<128x2xbf16>, vector<2x2xf32> -> vector<2x2xf32>
    %c0_8 = arith.constant 0 : index
    %c0_9 = arith.constant 0 : index
    %10 = vector.load %arg4[%c0_8, %c0_9] : memref<1x2xf32, #tpu.memory_space<vmem>>, vector<1x2xf32>
    %11 = vector.broadcast %10 : vector<1x2xf32> to vector<2x2xf32>
    %12 = arith.addf %9, %11 : vector<2x2xf32>
    %c0_10 = arith.constant 0 : index
    %c0_11 = arith.constant 0 : index
    %13 = vector.load %arg6[%c0_10, %c0_11] : memref<2x2xf32, #tpu.memory_space<vmem>>, vector<2x2xf32>
    tpu.vector_store %arg6[%c0_10, %c0_11], %12 {strides = array<i32>} : memref<2x2xf32, #tpu.memory_space<vmem>>, vector<2x2xf32>,
    %cst_12 = arith.constant dense<0xFF800000> : vector<2xf32>
    %14 = vector.multi_reduction <maximumf>, %12, %cst_12 [1] : vector<2x2xf32> to vector<2xf32>
    %15 = vector.shape_cast %14 : vector<2xf32> to vector<2x1xf32>
    %16 = vector.broadcast %15 : vector<2x1xf32> to vector<2x2xf32>
    %17 = arith.subf %12, %16 : vector<2x2xf32>
    %18 = math.exp %17 : vector<2x2xf32>
    %cst_13 = arith.constant dense<0.000000e+00> : vector<2xf32>
    %19 = vector.multi_reduction <add>, %18, %cst_13 [1] : vector<2x2xf32> to vector<2xf32>
    %20 = vector.shape_cast %19 : vector<2xf32> to vector<2x1xf32>
    %21 = vector.broadcast %20 : vector<2x1xf32> to vector<2x2xf32>
    %22 = arith.divf %18, %21 : vector<2x2xf32>
    %c0_14 = arith.constant 0 : index
    %c0_15 = arith.constant 0 : index
    %23 = vector.load %arg7[%c0_14, %c0_15] : memref<2x2xf32, #tpu.memory_space<vmem>>, vector<2x2xf32>
    tpu.vector_store %arg7[%c0_14, %c0_15], %22 {strides = array<i32>} : memref<2x2xf32, #tpu.memory_space<vmem>>, vector<2x2xf32>,
    %24 = vector.broadcast %15 : vector<2x1xf32> to vector<2x2xf32>
    %25 = arith.subf %12, %24 : vector<2x2xf32>
    %26 = math.log %20 : vector<2x1xf32>
    %27 = vector.broadcast %26 : vector<2x1xf32> to vector<2x2xf32>
    %28 = arith.subf %25, %27 : vector<2x2xf32>
    %c0_16 = arith.constant 0 : index
    %c0_17 = arith.constant 0 : index
    %29 = vector.load %arg5[%c0_16, %c0_17] : memref<2x2xf32, #tpu.memory_space<vmem>>, vector<2x2xf32>
    %30 = arith.mulf %29, %28 : vector<2x2xf32>
    %31 = vector.shape_cast %30 : vector<2x2xf32> to vector<1x2x2xf32>
    %cst_18 = arith.constant dense<0.000000e+00> : vector<1xf32>
    %32 = vector.multi_reduction <add>, %31, %cst_18 [1, 2] : vector<1x2x2xf32> to vector<1xf32>
    %33 = vector.shape_cast %32 : vector<1xf32> to vector<1x1x1xf32>
    %34 = vector.extract %33[0, 0, 0] : f32 from vector<1x1x1xf32>
    %35 = vector.broadcast %34 : f32 to vector<1x1xf32>
    %cst_19 = arith.constant 0.000000e+00 : f32
    %36 = vector.broadcast %cst_19 : f32 to vector<1x1xf32>
    %37 = arith.subf %36, %35 : vector<1x1xf32>
    %cst_20 = arith.constant 2.000000e+00 : f32
    %38 = vector.broadcast %cst_20 : f32 to vector<1x1xf32>
    %39 = arith.divf %37, %38 : vector<1x1xf32>
    %c0_21 = arith.constant 0 : index
    %c0_22 = arith.constant 0 : index
    %40 = vector.load %arg8[%c0_21, %c0_22] : memref<1x1xf32, #tpu.memory_space<vmem>>, vector<1x1xf32>
    tpu.vector_store %arg8[%c0_21, %c0_22], %39 {strides = array<i32>} : memref<1x1xf32, #tpu.memory_space<vmem>>, vector<1x1xf32>,
    return
  }
}

</mosaic_0001>

<bundles_post_ra>
// kernel: robert_forward.8
= control target key start
LH: loop header
LB: loop body
LE: loop exit
PB: predicated region body
PF: predicated region fallthrough
CT: control target
= control target key end

     0   :  { %s121_s0 = inlined_call_operand.vmem [shape: f32[16,128], index: 0, kind: input, shape index: {}]   ;;  %s122_s1 = inlined_call_operand.vmem [shape: f32[1,128], index: 1, kind: input, shape index: {}]   ;;  %s123_s2 = inlined_call_operand.vmem [shape: f32[1,128], index: 2, kind: input, shape index: {}]   ;;  %s124_s3 = inlined_call_operand.vmem [shape: bf16[16,128], index: 3, kind: output, shape index: {}]  }
   0x1   :  { %v14_v0 = vld [vmem:[%s121_s0] sm:$0xff]  ;;  %v15_v1 = vld [vmem:[%s121_s0 + $0x8] sm:$0xff] }
   0x2   :  { %18 = vadd.xlane.f32.xlu0 %v14_v0  ;;  %v71_v18 = vld [vmem:[%s122_s1] ss:$0 sm:$0xff] }
   0x3   :  { %v72_v22 = vld [vmem:[%s123_s2] ss:$0 sm:$0xff] }
   0x6   :  { %20 = vadd.xlane.f32.xlu0 %v15_v1 }
  0x8f   :  { %v19_v2 = vpop.xlane.xlu0 %18 }
  0x90   :  { %v23_v3 = vmul.f32 0.0078125, %v19_v2 }
  0x92   :  { %v25_v4 = vsub.f32 %v14_v0, %v23_v3 }
  0x93   :  { %v21_v5 = vpop.xlane.xlu0 %20 }
  0x94   :  { %v24_v6 = vmul.f32 0.0078125, %v21_v5  ;;  %v27_v7 = vmul.f32 %v25_v4, %v25_v4 }
  0x96   :  { %v26_v8 = vsub.f32 %v15_v1, %v24_v6  ;;  %29 = vadd.xlane.f32.xlu1 %v27_v7 }
  0x98   :  { %v28_v9 = vmul.f32 %v26_v8, %v26_v8 }
  0x9a   :  { %31 = vadd.xlane.f32.xlu1 %v28_v9 }
 0x123   :  { %v30_v10 = vpop.xlane.xlu1 %29 }
 0x124   :  { %v33_v11 = vmul.f32 0.0078125, %v30_v10 }
 0x126   :  { %v35_v12 = vadd.f32 1e-12, %v33_v11 }
 0x127   :  { %v32_v13 = vpop.xlane.xlu1 %31 }
 0x128   :  { %82 = vrsqrt.f32 %v35_v12  ;;  %v34_v14 = vmul.f32 0.0078125, %v32_v13 }
 0x12a   :  { %v36_v15 = vadd.f32 1e-12, %v34_v14 }
 0x12c   :  { %84 = vrsqrt.f32 %v36_v15 }
 0x132   :  { %v83_v16 = vpop.eup %82 }
 0x133   :  { %v39_v17 = vmul.f32 %v83_v16, %v25_v4 }
 0x135   :  { %v47_v20 = vmul.f32 %v71_v18, %v39_v17 }
 0x136   :  { %v85_v19 = vpop.eup %84 }
 0x137   :  { %v40_v21 = vmul.f32 %v85_v19, %v26_v8  ;;  %v55_v24 = vadd.f32 %v72_v22, %v47_v20 }
 0x139   :  { %v48_v23 = vmul.f32 %v71_v18, %v40_v21 }
 0x13b   :  { %v56_v25 = vadd.f32 %v72_v22, %v48_v23 }
 0x13d   :  { %v80_v26 = vpack.c.bf16 %v56_v25, %v55_v24 }
 0x13f   :  { %81 = vst [vmem:[%s124_s3] sm:$0xff] %v80_v26  }

// kernel: robert_forward.9
= control target key start
LH: loop header
LB: loop body
LE: loop exit
PB: predicated region body
PF: predicated region fallthrough
CT: control target
= control target key end

     0   :  { %v410_v0 = vmov 0.0   ;;  %vm411_vm0 = vmmov 0   ;;  %v412_v3 = vmov 0   ;;  %v51_v27 = vlaneseq  ;;  %s523_s1 = inlined_call_operand.vmem [shape: bf16[128,384], index: 1, kind: input, shape index: {}]   ;;  %s524_s0 = inlined_call_operand.vmem [shape: bf16[16,128], index: 0, kind: input, shape index: {}]   ;;  %s525_s2 = inlined_call_operand.vmem [shape: f32[1,384], index: 2, kind: input, shape index: {}]   ;;  %s526_s3 = inlined_call_operand.vmem [shape: bf16[16,384], index: 3, kind: output, shape index: {}]  }
   0x1   :  { %354 = vmatprep.subr.bf16.mxu1 %v410_v0  ;;  %v377_v1 = vld [vmem:[%s523_s1 + $0x4] ss:$12 sps:$4 sm:$0xff]   ;;  %370 = vmatprep.mubr.msk.bf16.mxu1 %vm411_vm0, %v410_v0  ;;  %v379_v2 = vld [vmem:[%s523_s1 + $0x8] ss:$12 sps:$4 sm:$0xff]   ;;  %v380_v4 = vld [vmem:[%s523_s1] ss:$12 sps:$4 sm:$0xff]  }
   0x2   :  { %232 = vmatprep.mubr.bf16.mxu0 %v412_v3  ;;  %200 = vmatprep.subr.bf16.mxu0 %v377_v1  ;;  %v381_v5 = vld [vmem:[%s523_s1 + $0x1c] ss:$12 sps:$4 sm:$0xff]   ;;  %v383_v6 = vld [vmem:[%s523_s1 + $0x20] ss:$12 sps:$4 sm:$0xff]   ;;  %v384_v7 = vld [vmem:[%s523_s1 + $0x18] ss:$12 sps:$4 sm:$0xff]  }
   0x3   :  { %355 = vmatpush3.bf16.msra.mxu1 %v379_v2  ;;  %201 = vmatpush1.bf16.msra.mxu0 %v380_v4  ;;  %v385_v8 = vld [vmem:[%s523_s1 + $0x34] ss:$12 sps:$4 sm:$0xff]   ;;  %v387_v9 = vld [vmem:[%s523_s1 + $0x38] ss:$12 sps:$4 sm:$0xff]   ;;  %v388_v10 = vld [vmem:[%s523_s1 + $0x30] ss:$12 sps:$4 sm:$0xff]  }
   0x4   :  { %356 = vmatprep.subr.bf16.mxu1 %v410_v0  ;;  %202 = vmatprep.subr.bf16.mxu0 %v381_v5  ;;  %v389_v11 = vld [vmem:[%s523_s1 + $0x4c] ss:$12 sps:$4 sm:$0xff]   ;;  %v391_v12 = vld [vmem:[%s523_s1 + $0x50] ss:$12 sps:$4 sm:$0xff]   ;;  %v392_v13 = vld [vmem:[%s523_s1 + $0x48] ss:$12 sps:$4 sm:$0xff]  }
   0x5   :  { %v393_v14 = vld [vmem:[%s523_s1 + $0x64] ss:$12 sps:$4 sm:$0xff]   ;;  %v395_v15 = vld [vmem:[%s523_s1 + $0x68] ss:$12 sps:$4 sm:$0xff]   ;;  %v396_v16 = vld [vmem:[%s523_s1 + $0x60] ss:$12 sps:$4 sm:$0xff]  }
   0x6   :  { %v397_v17 = vld [vmem:[%s523_s1 + $0x7c] ss:$12 sps:$4 sm:$0xff]   ;;  %v399_v18 = vld [vmem:[%s523_s1 + $0x80] ss:$12 sps:$4 sm:$0xff]   ;;  %v400_v19 = vld [vmem:[%s523_s1 + $0x78] ss:$12 sps:$4 sm:$0xff]  }
   0x7   :  { %357 = vmatpush3.bf16.msra.mxu1 %v383_v6  ;;  %203 = vmatpush1.bf16.msra.mxu0 %v384_v7  ;;  %v401_v20 = vld [vmem:[%s523_s1 + $0x94] ss:$12 sps:$4 sm:$0xff]   ;;  %v403_v21 = vld [vmem:[%s523_s1 + $0x98] ss:$12 sps:$4 sm:$0xff]   ;;  %v404_v22 = vld [vmem:[%s523_s1 + $0x90] ss:$12 sps:$4 sm:$0xff]  }
   0x8   :  { %358 = vmatprep.subr.bf16.mxu1 %v410_v0  ;;  %204 = vmatprep.subr.bf16.mxu0 %v385_v8  ;;  %v405_v23 = vld [vmem:[%s523_s1 + $0xac] ss:$12 sps:$4 sm:$0xff]   ;;  %v407_v24 = vld [vmem:[%s523_s1 + $0xb0] ss:$12 sps:$4 sm:$0xff]   ;;  %v408_v25 = vld [vmem:[%s523_s1 + $0xa8] ss:$12 sps:$4 sm:$0xff]  }
   0x9   :  { %v409_v26 = vld [vmem:[%s524_s0] sm:$0xff]   ;;  %v52_v28 = vshrl.u32 %v51_v27, 7 }
   0xa   :  { %v49_v30 = vld [vmem:[%s525_s2] sm:$0x7] }
   0xb   :  { %359 = vmatpush3.bf16.msra.mxu1 %v387_v9  ;;  %205 = vmatpush1.bf16.msra.mxu0 %v388_v10  ;;  %v61_v29 = vsub.s32 2, %v52_v28  ;;  %v53_v31 = vsub.s32 0, %v52_v28  ;;  %v57_v32 = vsub.s32 1, %v52_v28 }
   0xc   :  { %360 = vmatprep.subr.bf16.mxu1 %v410_v0  ;;  %206 = vmatprep.subr.bf16.mxu0 %v389_v11 }
   0xd   :  { %v62_v33 = vrot.slane %v49_v30, %v61_v29  ;;  %v54_v34 = vrot.slane %v49_v30, %v53_v31  ;;  %v58_v35 = vrot.slane %v49_v30, %v57_v32 }
   0xf   :  { %361 = vmatpush3.bf16.msra.mxu1 %v391_v12  ;;  %207 = vmatpush1.bf16.msra.mxu0 %v392_v13 }
  0x10   :  { %362 = vmatprep.subr.bf16.mxu1 %v410_v0  ;;  %208 = vmatprep.subr.bf16.mxu0 %v393_v14 }
  0x13   :  { %363 = vmatpush3.bf16.msra.mxu1 %v395_v15  ;;  %209 = vmatpush1.bf16.msra.mxu0 %v396_v16 }
  0x14   :  { %364 = vmatprep.subr.bf16.mxu1 %v410_v0  ;;  %210 = vmatprep.subr.bf16.mxu0 %v397_v17 }
  0x17   :  { %365 = vmatpush3.bf16.msra.mxu1 %v399_v18  ;;  %211 = vmatpush1.bf16.msra.mxu0 %v400_v19 }
  0x18   :  { %366 = vmatprep.subr.bf16.mxu1 %v410_v0  ;;  %212 = vmatprep.subr.bf16.mxu0 %v401_v20 }
  0x1b   :  { %367 = vmatpush3.bf16.msra.mxu1 %v403_v21  ;;  %213 = vmatpush1.bf16.msra.mxu0 %v404_v22 }
  0x1c   :  { %368 = vmatprep.subr.bf16.mxu1 %v410_v0  ;;  %214 = vmatprep.subr.bf16.mxu0 %v405_v23 }
  0x1f   :  { %369 = vmatpush3.bf16.msra.mxu1 %v407_v24  ;;  %215 = vmatpush1.bf16.msra.mxu0 %v408_v25 }
  0x22   :  { %371 = vmatmul.mubr.bf16.vlgmr.msra.gmra.mrb[0].mxu1 %v409_v26  ;;  %233 = vmatmul.mubr.bf16.vlgmr.msra.gmra.mrb[0].mxu0 %v409_v26 }
  0xf5   :  { %v277_v36 = vpop.f32.mrb[0].mxu1  ;;  %v234_v38 = vpop.f32.mrb[0].mxu0 }
  0xf6   :  { %v278_v37 = vadd.f32 %v277_v36, %v62_v33  ;;  %v372_v39 = vpop.f32.mrb[1].mxu1  ;;  %v235_v40 = vadd.f32 %v234_v38, %v54_v34  ;;  %v236_v41 = vpop.f32.mrb[1].mxu0 }
  0xf7   :  { %v280_v42 = vpop.f32.mrb[2].mxu1  ;;  %v237_v44 = vadd.f32 %v236_v41, %v58_v35  ;;  %v238_v46 = vpop.f32.mrb[2].mxu0 }
  0xf8   :  { %v342_v43 = vpack.c.bf16 %v278_v37, %v278_v37  ;;  %v281_v45 = vadd.f32 %v280_v42, %v62_v33  ;;  %v373_v47 = vpop.f32.mrb[3].mxu1  ;;  %v239_v48 = vadd.f32 %v238_v46, %v54_v34  ;;  %v240_v49 = vpop.f32.mrb[3].mxu0 }
  0xf9   :  { %v341_v50 = vpack.c.bf16 %v237_v44, %v235_v40  ;;  %v241_v52 = vadd.f32 %v240_v49, %v58_v35 }
  0xfa   :  { %305 = vst [vmem:[%s526_s3 + $0x8] sm:$0xf] %v342_v43  ;;  %v344_v51 = vpack.c.bf16 %v281_v45, %v281_v45 }
  0xfb   :  { %304 = vst [vmem:[%s526_s3] sm:$0xff] %v341_v50  ;;  %v343_v53 = vpack.c.bf16 %v241_v52, %v239_v48 }
  0xfc   :  { %307 = vst [vmem:[%s526_s3 + $0x14] sm:$0xf] %v344_v51 }
  0xfd   :  { %306 = vst [vmem:[%s526_s3 + $0xc] sm:$0xff] %v343_v53 }

// kernel: robert_forward.10
= control target key start
LH: loop header
LB: loop body
LE: loop exit
PB: predicated region body
PF: predicated region fallthrough
CT: control target
= control target key end

     0   :  { %s1652_s30 = smov 0   ;;  %s1654_s10 = smov 0   ;;  %s1839_s0 = inlined_call_operand.vmem [shape: bf16[2,8,384], index: 0, kind: input, shape index: {}, may-alias: {0,1,2}]   ;;  %s1840_s1 = inlined_call_operand.vmem [shape: bf16[2,8,384], index: 1, kind: input, shape index: {}, may-alias: {0,1,2}]   ;;  %s1841_s2 = inlined_call_operand.vmem [shape: bf16[2,8,384], index: 2, kind: input, shape index: {}, may-alias: {0,1,2}]   ;;  %s1842_s3 = inlined_call_operand.vmem [shape: f32[2,1,8], index: 3, kind: input, shape index: {}]   ;;  %s1843_s4 = inlined_call_operand.vmem [shape: bf16[2,8,128], index: 4, kind: input, shape index: {}]   ;;  %s1844_s5 = inlined_call_operand.vmem [shape: bf16[128,128], index: 5, kind: input, shape index: {}]   ;;  %s1845_s6 = inlined_call_operand.vmem [shape: f32[1,128], index: 6, kind: input, shape index: {}]   ;;  %s1846_s7 = inlined_call_operand.vmem [shape: f32[1,128], index: 7, kind: input, shape index: {}]   ;;  %s1847_s8 = inlined_call_operand.vmem [shape: f32[1,128], index: 8, kind: input, shape index: {}]   ;;  %s1848_s9 = inlined_call_operand.vmem [shape: bf16[2,8,128], index: 9, kind: output, shape index: {}]  }
   0x1   :  { %s1656_s11 = smov 0  }
   0x2 LB: > { %s31_s12 = sadd.s32 1, %s1590_s10  ;;  %p1428_p0 = scmp.ge.s32.totalorder %s1594_s11, 1  ;;  %s1594_s11 = sphi %s1656_s11, %s19_s11   ;;  %s1590_s10 = sphi %s1654_s10, %s1850_s10   ;;  %s1586_s30 = sphi %s1652_s30, %s1849_s30  }
   0x3   : > { %p33_p1 = scmp.ge.s32.totalorder %s31_s12, 2  ;;  %p351_p2 = scmp.lt.s32.totalorder %s1594_s11, 3 }
   0x5   : > { %s1852_s12 = smov (%p33_p1, %s31_s12), 0  ;;  %p352_p3 = pnand %p1428_p0, %p351_p2 }
   0x6   : > { %p415_p4 = scmp.lt.s32.totalorder (!%p352_p3), %s1586_s30, 1  ;;  %s1596_s20 = smov (!%p352_p3), 64   ;;  %v1597_v2 = vmov (!%p352_p3), 0.0   ;;  %vm1598_vm0 = vmmov (!%p352_p3), 0   ;;  %v1599_v3 = vmov (!%p352_p3), 1983009808   ;;  %v468_v5 = vlaneseq (!%p352_p3) }
   0x7   : > { %355 = sbr.rel (%p352_p3) target bundleno = 1580 (0x62c), region = 56  ;;  %1479 = vmatprep.subr.bf16.mxu1 (!%p352_p3), %v1597_v2  ;;  %1503 = vmatprep.subr.bf16.mxu0 (!%p352_p3), %v1597_v2  ;;  %v466_v4 = vunpack.c.l.s4 (!%p352_p3), %v1599_v3  ;;  %v1600_v8 = vmov (!%p352_p3), 1934713408   ;;  %v1601_v21 = vmov (!%p352_p3), 0   ;;  %vm796_vm1 = vcmask (!%p352_p3), 523264  }
   0x8   : > { %1481 = vmatprep.mubr.msk.bf16.mxu1 (!%p352_p3), %vm1598_vm0, %v1597_v2  ;;  %1519 = vmatprep.mubr.msk.bf16.mxu0 (!%p352_p3), %vm1598_vm0, %v1597_v2  ;;  %v469_v7 = vshrl.u32 (!%p352_p3), %v468_v5, 7  ;;  %v474_v9 = vunpack.c.l.s4 (!%p352_p3), %v1600_v8  ;;  %vm900_vm2 = vcmask (!%p352_p3), 64512   ;;  %vm928_vm3 = vcmask (!%p352_p3), 1043456  }
   0x9   : > { %v467_v6 = vunpack.c.0.s8 (!%p352_p3), %v466_v4 }
   0xa   : > { %v475_v12 = vunpack.c.0.s8 (!%p352_p3), %v474_v9 }
   0xb   : > { %v1691_v11 = vsub.s32 (!%p352_p3), %v467_v6, %v469_v7 }
   0xc   : > { %v1693_v16 = vsub.s32 (!%p352_p3), %v475_v12, %v469_v7 }
   0xe   : > { %s1854_s30 = smov (!%p415_p4, %s1586_s30), 1 }
   0xf   : > { %s1673_s13 = smul.u32 12, %s1854_s30  ;;  %s438_s23 = scalar_lea.vmem %s1842_s3, %s1854_s30 }
  0x10   : > { %s1432_s27 = sshll.u32 %s1854_s30, 2 }
  0x11   : > { %s1353_s16 = scalar_lea.vmem %s1840_s1, %s1673_s13  ;;  %s423_s19 = scalar_lea.vmem %s1839_s0, %s1673_s13 }
  0x12   : > { %v1436_v0 = vld [vmem:[%s1353_s16 + $0x4] sm:$0xf]  ;;  %v454_v1 = vld [vmem:[%s423_s19] sm:$0xf]  ;;  %s1357_s26 = scalar_lea.vmem %s1841_s2, %s1673_s13  ;;  %s445_s13 = scalar_lea.vmem %s1843_s4, %s1432_s27 }
  0x13   : > { %570 = vrot.lane.b32.xlu0 %v1436_v0, %s1596_s20  ;;  %v575_v10 = vshrl.u32 %v1436_v0, 16  ;;  %v461_v19 = vshrl.u32 %v454_v1, 16  ;;  %s452_s21 = scalar_lea.vmem %s1848_s9, %s1432_s27 }
  0x17   : > { %456 = vrot.lane.b32.xlu0 %v454_v1, %s1596_s20 }
  0x85   : > { %v571_v13 = vpop.permute.xlu0 %570 }
  0x86   : > { %v574_v14 = vpack.i.b16 %v571_v13, %v1436_v0  ;;  %v576_v15 = vshrl.u32 %v571_v13, 16  ;;  %v1444_v13 = vld [vmem:[%s438_s23] ss:$0 sm:$0xff] }
  0x88   : > { %v577_v17 = vpack.i.b16 %v576_v15, %v575_v10  ;;  %v585_v18 = vrot.slane %v574_v14, %v1691_v11 }
  0x89   : > { %v457_v20 = vpop.permute.xlu0 %456 }
  0x8a   : > { %v586_v22 = vcombine.high %v585_v18, %v1601_v21  ;;  %v610_v23 = vrot.slane %v577_v17, %v1691_v11  ;;  %v460_v24 = vpack.i.b16 %v457_v20, %v454_v1  ;;  %v462_v25 = vshrl.u32 %v457_v20, 16 }
  0x8b   : > { %v593_v26 = vrot.slane %v585_v18, %v1693_v16 }
  0x8c   : > { %v600_v27 = vrot.slane %v586_v22, %v1693_v16  ;;  %v611_v28 = vcombine.high %v610_v23, %v1601_v21  ;;  %v471_v29 = vrot.slane %v460_v24, %v1691_v11  ;;  %v618_v30 = vrot.slane %v610_v23, %v1693_v16 }
  0x8d   : > { %v463_v31 = vpack.i.b16 %v462_v25, %v461_v19 }
  0x8e   : > { %v625_v32 = vrot.slane %v611_v28, %v1693_v16  ;;  %v628_v33 = vcombine.low %v593_v26, %v600_v27  ;;  %v1437_v34 = vcombine.high %v593_v26, %v600_v27  ;;  %v472_v35 = vcombine.high %v471_v29, %v1601_v21 }
  0x8f   : > { %v479_v36 = vrot.slane %v471_v29, %v1693_v16  ;;  %v496_v37 = vrot.slane %v463_v31, %v1691_v11  ;;  %v1439_v29 = vld [vmem:[%s1357_s26 + $0x8] sm:$0xf] }
  0x90   : > { %v652_v38 = vcombine.low %v618_v30, %v625_v32  ;;  %v1438_v39 = vcombine.high %v618_v30, %v625_v32  ;;  %v486_v40 = vrot.slane %v472_v35, %v1693_v16  ;;  %v635_v41 = vrot.slane %v628_v33, %v1691_v11 }
  0x91   : > { %v497_v42 = vcombine.high %v496_v37, %v1601_v21  ;;  %v504_v43 = vrot.slane %v496_v37, %v1693_v16  ;;  %v643_v44 = vrot.slane %v1437_v34, %v1691_v11  ;;  %v689_v35 = vshrl.u32 %v1439_v29, 16 }
  0x92   : > { %v514_v45 = vcombine.low %v479_v36, %v486_v40  ;;  %v1434_v46 = vcombine.high %v479_v36, %v486_v40  ;;  %v659_v47 = vrot.slane %v652_v38, %v1691_v11  ;;  %v667_v48 = vrot.slane %v1438_v39, %v1691_v11 }
  0x93   : > { %v511_v49 = vrot.slane %v497_v42, %v1693_v16  ;;  %v644_v50 = vcombine.low %v635_v41, %v643_v44 }
  0x94   : > { %v521_v51 = vrot.slane %v514_v45, %v1691_v11  ;;  %v529_v52 = vrot.slane %v1434_v46, %v1691_v11  ;;  %v668_v53 = vcombine.low %v659_v47, %v667_v48 }
  0x95   : > { %v538_v54 = vcombine.low %v504_v43, %v511_v49  ;;  %v1435_v55 = vcombine.high %v504_v43, %v511_v49  ;;  %v651_v56 = vrot.slane %v644_v50, %v1693_v16 }
  0x96   : > { %v675_v57 = vrot.slane %v668_v53, %v1693_v16  ;;  %v530_v61 = vcombine.low %v521_v51, %v529_v52 }
  0x97   : > { %v545_v58 = vrot.slane %v538_v54, %v1691_v11  ;;  %v553_v59 = vrot.slane %v1435_v55, %v1691_v11  ;;  %v679_v1 = vshrl.u32 %v651_v56, 16 }
  0x98   : > { %v678_v60 = vpack.i.b16 %v675_v57, %v651_v56  ;;  %v680_v63 = vshrl.u32 %v675_v57, 16  ;;  %v537_v3 = vrot.slane %v530_v61, %v1693_v16 }
  0x99   : > { %v554_v62 = vcombine.low %v545_v58, %v553_v59 }
  0x9a   : > { %v801_v0 = vsel %vm796_vm1, %v678_v60, 0  ;;  %v681_v5 = vpack.i.b16 %v680_v63, %v679_v1  ;;  %v565_v8 = vshrl.u32 %v537_v3, 16 }
  0x9b   : > { %1480 = vmatpush3.bf16.xpose.msra.mxu1 %v801_v0  ;;  %v561_v4 = vrot.slane %v554_v62, %v1693_v16 }
  0x9c   : > { %1485 = vmatprep.subr.bf16.mxu1 %v1597_v2  ;;  %v847_v7 = vsel %vm796_vm1, %v681_v5, 0 }
  0x9d   : > { %v564_v6 = vpack.i.b16 %v561_v4, %v537_v3  ;;  %v566_v9 = vshrl.u32 %v561_v4, 16 }
  0x9f   : > { %v567_v10 = vpack.i.b16 %v566_v9, %v565_v8 }
  0xa2   : > { %1482 = vmatmul.mubr.msk.bf16.vlgmr.msra.gmra.mrb[0].mxu1 %vm796_vm1, %v564_v6 }
  0xa3   : > { %1486 = vmatpush3.bf16.xpose.msra.mxu1 %v847_v7  ;;  %1487 = vmatprep.mubr.msk.bf16.mxu1 %vm1598_vm0, %v1597_v2 }
  0xa4   : > { %1491 = vmatprep.subr.bf16.mxu1 %v1597_v2 }
  0xaa   : > { %1488 = vmatmul.mubr.msk.bf16.vlgmr.msra.gmra.mrb[4].mxu1 %vm796_vm1, %v567_v10 }
  0xab   : > { %1493 = vmatprep.mubr.msk.bf16.mxu1 %vm1598_vm0, %v1597_v2 }
 0x175   : > { %v837_v12 = vpop.f32.mrb[0].mxu1 }
 0x176   : > { %v889_v14 = vmul.f32 0.125, %v837_v12  ;;  %v1483_v15 = vpop.f32.mrb[1].mxu1 }
 0x177   : > { %v840_v17 = vpop.f32.mrb[2].mxu1 }
 0x178   : > { %v1484_v18 = vpop.f32.mrb[3].mxu1  ;;  %v898_v19 = vadd.f32 %v1444_v13, %v889_v14  ;;  %v1554_v17 = vld [vmem:[%s1844_s5] sm:$0xff]  }
 0x179   : > { %1504 = vmatpush3.bf16.msra.mxu0 %v1554_v17  ;;  %v1555_v18 = vld [vmem:[%s1844_s5 + $0x8] sm:$0xff]   ;;  %v1458_v17 = vld [vmem:[%s1846_s7] ss:$0 sm:$0xff] }
 0x17a   : > { %v901_v20 = vsel %vm900_vm2, %v898_v19, -inf  ;;  %1505 = vmatprep.subr.bf16.mxu0 %v1597_v2 }
 0x17b   : > { %902 = vmax.xlane.f32.xlu1 %v901_v20  ;;  %v1557_v20 = vld [vmem:[%s1844_s5 + $0x18] sm:$0xff]  }
 0x17d   : > { %v883_v22 = vpop.f32.mrb[4].mxu1  ;;  %1506 = vmatpush3.bf16.msra.mxu0 %v1555_v18 }
 0x17e   : > { %v890_v23 = vmul.f32 0.125, %v883_v22  ;;  %v1489_v24 = vpop.f32.mrb[5].mxu1  ;;  %1507 = vmatprep.subr.bf16.mxu0 %v1597_v2  ;;  %v1558_v22 = vld [vmem:[%s1844_s5 + $0x20] sm:$0xff]  }
 0x17f   : > { %v886_v25 = vpop.f32.mrb[6].mxu1  ;;  %v1560_v24 = vld [vmem:[%s1844_s5 + $0x30] sm:$0xff]  }
 0x180   : > { %v1490_v26 = vpop.f32.mrb[7].mxu1  ;;  %v899_v27 = vadd.f32 %v1444_v13, %v890_v23  ;;  %v1559_v23 = vld [vmem:[%s1844_s5 + $0x28] sm:$0xff]  }
 0x182   : > { %v904_v28 = vsel %vm900_vm2, %v899_v27, -inf }
 0x183   : > { %905 = vmax.xlane.f32.xlu1 %v904_v28 }
 0x194   : > { %684 = vrot.lane.b32.xlu1 %v1439_v29, %s1596_s20 }
 0x208   : > { %v903_v30 = vpop.xlane.xlu1 %902 }
 0x209   : > { %v907_v31 = vsub.f32 %v898_v19, %v903_v30  ;;  %v1556_v19 = vld [vmem:[%s1844_s5 + $0x10] sm:$0xff]  }
 0x20a   : > { %1508 = vmatpush3.bf16.msra.mxu0 %v1556_v19  ;;  %v1459_v19 = vld [vmem:[%s1847_s8] ss:$0 sm:$0xff] }
 0x20b   : > { %v909_v32 = vmul.f32 1.442695, %v907_v31  ;;  %1509 = vmatprep.subr.bf16.mxu0 %v1597_v2 }
 0x20d   : > { %1562 = vpow2.f32 %v909_v32 }
 0x20e   : > { %1510 = vmatpush3.bf16.msra.mxu0 %v1557_v20 }
 0x20f   : > { %1511 = vmatprep.subr.bf16.mxu0 %v1597_v2 }
 0x210   : > { %v906_v33 = vpop.xlane.xlu1 %905 }
 0x211   : > { %v908_v34 = vsub.f32 %v899_v27, %v906_v33 }
 0x212   : > { %1512 = vmatpush3.bf16.msra.mxu0 %v1558_v22 }
 0x213   : > { %v911_v36 = vmul.f32 1.442695, %v908_v34  ;;  %1513 = vmatprep.subr.bf16.mxu0 %v1597_v2 }
 0x214   : > { %v685_v37 = vpop.permute.xlu1 %684 }
 0x215   : > { %1564 = vpow2.f32 %v911_v36  ;;  %v688_v38 = vpack.i.b16 %v685_v37, %v1439_v29  ;;  %v690_v39 = vshrl.u32 %v685_v37, 16 }
 0x216   : > { %1514 = vmatpush3.bf16.msra.mxu0 %v1559_v23 }
 0x217   : > { %v1563_v40 = vpop.eup %1562  ;;  %v691_v41 = vpack.i.b16 %v690_v39, %v689_v35  ;;  %v699_v42 = vrot.slane %v688_v38, %v1691_v11  ;;  %1515 = vmatprep.subr.bf16.mxu0 %v1597_v2 }
 0x218   : > { %v913_v43 = vsel %vm900_vm2, %v1563_v40, 0.0 }
 0x219   : > { %914 = vadd.xlane.f32.xlu0 %v913_v43  ;;  %v700_v44 = vcombine.high %v699_v42, %v1601_v21  ;;  %v707_v45 = vrot.slane %v699_v42, %v1693_v16  ;;  %v724_v46 = vrot.slane %v691_v41, %v1691_v11 }
 0x21a   : > { %1516 = vmatpush3.bf16.msra.mxu0 %v1560_v24 }
 0x21b   : > { %v714_v47 = vrot.slane %v700_v44, %v1693_v16  ;;  %v725_v48 = vcombine.high %v724_v46, %v1601_v21  ;;  %v732_v49 = vrot.slane %v724_v46, %v1693_v16  ;;  %1517 = vmatprep.subr.bf16.mxu0 %v1597_v2 }
 0x21d   : > { %v739_v50 = vrot.slane %v725_v48, %v1693_v16  ;;  %v742_v51 = vcombine.low %v707_v45, %v714_v47  ;;  %v1440_v52 = vcombine.high %v707_v45, %v714_v47 }
 0x21f   : > { %v1565_v53 = vpop.eup %1564  ;;  %v749_v54 = vrot.slane %v742_v51, %v1691_v11  ;;  %v757_v55 = vrot.slane %v1440_v52, %v1691_v11  ;;  %v766_v56 = vcombine.low %v732_v49, %v739_v50  ;;  %v1441_v57 = vcombine.high %v732_v49, %v739_v50 }
 0x220   : > { %v916_v58 = vsel %vm900_vm2, %v1565_v53, 0.0 }
 0x221   : > { %917 = vadd.xlane.f32.xlu1 %v916_v58  ;;  %v758_v59 = vcombine.low %v749_v54, %v757_v55  ;;  %v773_v60 = vrot.slane %v766_v56, %v1691_v11  ;;  %v781_v21 = vrot.slane %v1441_v57, %v1691_v11 }
 0x223   : > { %v765_v61 = vrot.slane %v758_v59, %v1693_v16  ;;  %v782_v62 = vcombine.low %v773_v60, %v781_v21 }
 0x225   : > { %v789_v63 = vrot.slane %v782_v62, %v1693_v16  ;;  %v793_v0 = vshrl.u32 %v765_v61, 16 }
 0x227   : > { %v792_v1 = vpack.i.b16 %v789_v63, %v765_v61  ;;  %v794_v3 = vshrl.u32 %v789_v63, 16  ;;  %v1449_v63 = vld [vmem:[%s1845_s6] ss:$0 sm:$0xff] }
 0x229   : > { %v930_v4 = vsel %vm928_vm3, %v792_v1, 0  ;;  %v795_v5 = vpack.i.b16 %v794_v3, %v793_v0 }
 0x22a   : > { %1492 = vmatpush3.bf16.msra.mxu1 %v930_v4 }
 0x22b   : > { %1497 = vmatprep.subr.bf16.mxu1 %v1597_v2  ;;  %v976_v6 = vsel %vm928_vm3, %v795_v5, 0 }
 0x2a6   : > { %v915_v7 = vpop.xlane.xlu0 %914 }
 0x2a7   : > { %1566 = vrcp.f32 %v915_v7 }
 0x2ae   : > { %v918_v8 = vpop.xlane.xlu1 %917 }
 0x2af   : > { %1568 = vrcp.f32 %v918_v8 }
 0x2b1   : > { %v1567_v9 = vpop.eup %1566 }
 0x2b2   : > { %v921_v10 = vmul.f32 %v1567_v9, %v1563_v40 }
 0x2b4   : > { %v923_v12 = vpack.c.bf16 %v921_v10, %v921_v10 }
 0x2b6   : > { %1494 = vmatmul.mubr.msk.bf16.vlgmr.msra.gmra.mrb[8].mxu1 %vm900_vm2, %v923_v12 }
 0x2b7   : > { %1498 = vmatpush3.bf16.msra.mxu1 %v976_v6  ;;  %1499 = vmatprep.mubr.msk.bf16.mxu1 %vm1598_vm0, %v1597_v2 }
 0x2b9   : > { %v1569_v13 = vpop.eup %1568 }
 0x2ba   : > { %v922_v14 = vmul.f32 %v1569_v13, %v1565_v53 }
 0x2bc   : > { %v924_v15 = vpack.c.bf16 %v922_v14, %v922_v14 }
 0x2be   : > { %1500 = vmatmul.mubr.msk.bf16.vlgmr.msra.gmra.mrb[12].mxu1 %vm900_vm2, %v924_v15 }
 0x389   : > { %v966_v25 = vpop.f32.mrb[8].mxu1 }
 0x38a   : > { %v1495_v26 = vpop.f32.mrb[9].mxu1  ;;  %v1018_v29 = vcombine.high %v966_v25, %v1597_v2  ;;  %v1025_v31 = vrot.slane %v966_v25, %v1691_v11 }
 0x38b   : > { %v969_v27 = vpop.f32.mrb[10].mxu1 }
 0x38c   : > { %v1496_v28 = vpop.f32.mrb[11].mxu1  ;;  %v1032_v36 = vrot.slane %v1018_v29, %v1691_v11 }
 0x391   : > { %v1012_v30 = vpop.f32.mrb[12].mxu1 }
 0x392   : > { %v1033_v32 = vcombine.high %v1012_v30, %v1597_v2  ;;  %v1040_v33 = vrot.slane %v1012_v30, %v1691_v11  ;;  %v1501_v34 = vpop.f32.mrb[13].mxu1  ;;  %v1561_v2 = vld [vmem:[%s1844_s5 + $0x38] sm:$0xff]  }
 0x393   : > { %v1015_v35 = vpop.f32.mrb[14].mxu1  ;;  %1518 = vmatpush3.bf16.msra.mxu0 %v1561_v2 }
 0x394   : > { %v1047_v37 = vrot.slane %v1033_v32, %v1691_v11  ;;  %v1048_v38 = vcombine.low %v1025_v31, %v1040_v33  ;;  %v1049_v39 = vcombine.high %v1025_v31, %v1040_v33  ;;  %v1502_v40 = vpop.f32.mrb[15].mxu1 }
 0x396   : > { %v1056_v41 = vrot.slane %v1048_v38, %v1693_v16  ;;  %v1063_v42 = vrot.slane %v1049_v39, %v1693_v16  ;;  %v1064_v43 = vcombine.low %v1032_v36, %v1047_v37  ;;  %v1065_v44 = vcombine.high %v1032_v36, %v1047_v37 }
 0x398   : > { %v1072_v45 = vrot.slane %v1064_v43, %v1693_v16  ;;  %v1079_v46 = vrot.slane %v1065_v44, %v1693_v16  ;;  %v1084_v47 = vcombine.low %v1056_v41, %v1063_v42  ;;  %v1447_v48 = vcombine.high %v1056_v41, %v1063_v42 }
 0x39a   : > { %v1091_v49 = vrot.slane %v1084_v47, %v1691_v11  ;;  %v1099_v50 = vrot.slane %v1447_v48, %v1691_v11  ;;  %v1100_v51 = vcombine.low %v1072_v45, %v1079_v46  ;;  %v1448_v52 = vcombine.high %v1072_v45, %v1079_v46 }
 0x39c   : > { %v1107_v53 = vrot.slane %v1100_v51, %v1691_v11  ;;  %v1115_v54 = vrot.slane %v1448_v52, %v1691_v11  ;;  %v1116_v55 = vcombine.low %v1091_v49, %v1099_v50  ;;  %v1251_v11 = vld [vmem:[%s445_s13] sm:$0xf] }
 0x39e   : > { %v1124_v56 = vcombine.low %v1107_v53, %v1115_v54  ;;  %v1123_v57 = vrot.slane %v1116_v55, %v1693_v16 }
 0x3a0   : > { %v1131_v58 = vrot.slane %v1124_v56, %v1693_v16  ;;  %v1252_v16 = vunpack.c.l.bf16 %v1251_v11 }
 0x3a2   : > { %v1133_v59 = vcombine.high %v1123_v57, %v1131_v58  ;;  %v1132_v60 = vcombine.low %v1123_v57, %v1131_v58 }
 0x3a4   : > { %1135 = vrot.lane.b32.xlu0 %v1133_v59, %s1596_s20 }
 0x416   : > { %v1136_v21 = vpop.permute.xlu0 %1135 }
 0x417   : > { %v1138_v61 = vsel %vm796_vm1, %v1132_v60, %v1136_v21 }
 0x418   : > { %v1139_v62 = vpack.c.bf16 %v1138_v61, %v1138_v61 }
 0x41a   : > { %1520 = vmatmul.mubr.bf16.vlgmr.msra.gmra.mrb[0].mxu0 %v1139_v62 }
 0x4ed   : > { %v1245_v0 = vpop.f32.mrb[0].mxu0 }
 0x4ee   : > { %v1246_v1 = vadd.f32 %v1449_v63, %v1245_v0  ;;  %v1521_v3 = vpop.f32.mrb[1].mxu0 }
 0x4ef   : > { %v1248_v4 = vpop.f32.mrb[2].mxu0 }
 0x4f0   : > { %v1522_v5 = vpop.f32.mrb[3].mxu0  ;;  %v1253_v6 = vadd.f32 %v1252_v16, %v1246_v1 }
 0x4f2   : > { %1256 = vadd.xlane.f32.xlu0 %v1253_v6 }
 0x57f   : > { %v1257_v7 = vpop.xlane.xlu0 %1256 }
 0x580   : > { %v1259_v8 = vmul.f32 0.0078125, %v1257_v7 }
 0x582   : > { %v1260_v9 = vsub.f32 %v1253_v6, %v1259_v8 }
 0x584   : > { %v1261_v10 = vmul.f32 %v1260_v9, %v1260_v9 }
 0x586   : > { %1262 = vadd.xlane.f32.xlu1 %v1261_v10 }
 0x613   : > { %v1263_v12 = vpop.xlane.xlu1 %1262 }
 0x614   : > { %v1264_v13 = vmul.f32 0.0078125, %v1263_v12 }
 0x616   : > { %v1265_v14 = vadd.f32 1e-12, %v1264_v13 }
 0x618   : > { %1570 = vrsqrt.f32 %v1265_v14 }
 0x622   : > { %v1571_v15 = vpop.eup %1570 }
 0x623   : > { %v1267_v18 = vmul.f32 %v1571_v15, %v1260_v9 }
 0x625   : > { %v1274_v20 = vmul.f32 %v1458_v17, %v1267_v18 }
 0x627   : > { %v1281_v22 = vadd.f32 %v1459_v19, %v1274_v20 }
 0x629   : > { %v1282_v23 = vpack.c.bf16 %v1281_v22, %v1281_v22 }
 0x62b   : > { %1283 = vst [vmem:[%s452_s21] sm:$0xf] %v1282_v23 }
 0x62c PF: > { %s19_s11 = sadd.s32 1, %s1594_s11   ;;  %s1849_s30 = smov %s1590_s10 }
 0x62d   : > { %p16_p5 = scmp.ge.s32.totalorder %s19_s11, 4   ;;  %s1850_s10 = smov %s1852_s12 }
 0x62f   :  { %18 = sbr.rel (!%p16_p5) target bundleno = 2 (0x2), region = 98 }

// kernel: robert_forward.11
= control target key start
LH: loop header
LB: loop body
LE: loop exit
PB: predicated region body
PF: predicated region fallthrough
CT: control target
= control target key end

     0   :  { %v1066_v1 = vmov 0   ;;  %s1367_s1 = inlined_call_operand.vmem [shape: bf16[128,512], index: 1, kind: input, shape index: {}]   ;;  %s1368_s0 = inlined_call_operand.vmem [shape: bf16[16,128], index: 0, kind: input, shape index: {}, may-alias: {0,5}]   ;;  %s1369_s3 = inlined_call_operand.vmem [shape: bf16[512,128], index: 3, kind: input, shape index: {}]   ;;  %s1370_s2 = inlined_call_operand.vmem [shape: f32[1,512], index: 2, kind: input, shape index: {}]   ;;  %s1371_s5 = inlined_call_operand.vmem [shape: bf16[16,128], index: 5, kind: input, shape index: {}, may-alias: {0,5}]   ;;  %s1372_s4 = inlined_call_operand.vmem [shape: f32[1,128], index: 4, kind: input, shape index: {}]   ;;  %s1373_s6 = inlined_call_operand.vmem [shape: f32[1,128], index: 6, kind: input, shape index: {}]   ;;  %s1374_s7 = inlined_call_operand.vmem [shape: f32[1,128], index: 7, kind: input, shape index: {}]   ;;  %s1375_s8 = inlined_call_operand.vmem [shape: bf16[16,128], index: 8, kind: output, shape index: {}]  }
   0x1   :  { %v965_v0 = vld [vmem:[%s1367_s1 + $0x4] ss:$16 sps:$4 sm:$0xff]   ;;  %290 = vmatprep.mubr.bf16.mxu0 %v1066_v1  ;;  %333 = vmatprep.mubr.bf16.mxu1 %v1066_v1  ;;  %v967_v2 = vld [vmem:[%s1367_s1 + $0xc] ss:$16 sps:$4 sm:$0xff]   ;;  %v969_v3 = vld [vmem:[%s1367_s1] ss:$16 sps:$4 sm:$0xff]  }
   0x2   :  { %258 = vmatprep.subr.bf16.mxu0 %v965_v0  ;;  %v970_v4 = vld [vmem:[%s1367_s1 + $0x8] ss:$16 sps:$4 sm:$0xff]   ;;  %301 = vmatprep.subr.bf16.mxu1 %v967_v2  ;;  %v971_v5 = vld [vmem:[%s1367_s1 + $0x24] ss:$16 sps:$4 sm:$0xff]   ;;  %v973_v6 = vld [vmem:[%s1367_s1 + $0x2c] ss:$16 sps:$4 sm:$0xff]   ;;  %v72_v2 = vlaneseq }
   0x3   :  { %259 = vmatpush1.bf16.msra.mxu0 %v969_v3  ;;  %302 = vmatpush1.bf16.msra.mxu1 %v970_v4  ;;  %v975_v7 = vld [vmem:[%s1367_s1 + $0x20] ss:$16 sps:$4 sm:$0xff]   ;;  %v976_v8 = vld [vmem:[%s1367_s1 + $0x28] ss:$16 sps:$4 sm:$0xff]   ;;  %v977_v9 = vld [vmem:[%s1367_s1 + $0x44] ss:$16 sps:$4 sm:$0xff]  }
   0x4   :  { %260 = vmatprep.subr.bf16.mxu0 %v971_v5  ;;  %303 = vmatprep.subr.bf16.mxu1 %v973_v6  ;;  %v979_v10 = vld [vmem:[%s1367_s1 + $0x4c] ss:$16 sps:$4 sm:$0xff]   ;;  %v981_v11 = vld [vmem:[%s1367_s1 + $0x40] ss:$16 sps:$4 sm:$0xff]   ;;  %v982_v12 = vld [vmem:[%s1367_s1 + $0x48] ss:$16 sps:$4 sm:$0xff]  }
   0x5   :  { %v983_v13 = vld [vmem:[%s1367_s1 + $0x64] ss:$16 sps:$4 sm:$0xff]   ;;  %v985_v14 = vld [vmem:[%s1367_s1 + $0x6c] ss:$16 sps:$4 sm:$0xff]   ;;  %v987_v15 = vld [vmem:[%s1367_s1 + $0x60] ss:$16 sps:$4 sm:$0xff]  }
   0x6   :  { %v988_v16 = vld [vmem:[%s1367_s1 + $0x68] ss:$16 sps:$4 sm:$0xff]   ;;  %v989_v17 = vld [vmem:[%s1367_s1 + $0x84] ss:$16 sps:$4 sm:$0xff]   ;;  %v991_v18 = vld [vmem:[%s1367_s1 + $0x8c] ss:$16 sps:$4 sm:$0xff]  }
   0x7   :  { %261 = vmatpush1.bf16.msra.mxu0 %v975_v7  ;;  %304 = vmatpush1.bf16.msra.mxu1 %v976_v8  ;;  %v993_v19 = vld [vmem:[%s1367_s1 + $0x80] ss:$16 sps:$4 sm:$0xff]   ;;  %v994_v20 = vld [vmem:[%s1367_s1 + $0x88] ss:$16 sps:$4 sm:$0xff]   ;;  %v995_v21 = vld [vmem:[%s1367_s1 + $0xa4] ss:$16 sps:$4 sm:$0xff]  }
   0x8   :  { %262 = vmatprep.subr.bf16.mxu0 %v977_v9  ;;  %305 = vmatprep.subr.bf16.mxu1 %v979_v10  ;;  %v997_v22 = vld [vmem:[%s1367_s1 + $0xac] ss:$16 sps:$4 sm:$0xff]   ;;  %v999_v23 = vld [vmem:[%s1367_s1 + $0xa0] ss:$16 sps:$4 sm:$0xff]   ;;  %v1000_v24 = vld [vmem:[%s1367_s1 + $0xa8] ss:$16 sps:$4 sm:$0xff]  }
   0x9   :  { %v1001_v25 = vld [vmem:[%s1367_s1 + $0xc4] ss:$16 sps:$4 sm:$0xff]   ;;  %v1003_v26 = vld [vmem:[%s1367_s1 + $0xcc] ss:$16 sps:$4 sm:$0xff]   ;;  %v1005_v27 = vld [vmem:[%s1367_s1 + $0xc0] ss:$16 sps:$4 sm:$0xff]  }
   0xa   :  { %v1006_v28 = vld [vmem:[%s1367_s1 + $0xc8] ss:$16 sps:$4 sm:$0xff]   ;;  %v1007_v29 = vld [vmem:[%s1367_s1 + $0xe4] ss:$16 sps:$4 sm:$0xff]   ;;  %v1009_v30 = vld [vmem:[%s1367_s1 + $0xec] ss:$16 sps:$4 sm:$0xff]  }
   0xb   :  { %263 = vmatpush1.bf16.msra.mxu0 %v981_v11  ;;  %306 = vmatpush1.bf16.msra.mxu1 %v982_v12  ;;  %v1011_v31 = vld [vmem:[%s1367_s1 + $0xe0] ss:$16 sps:$4 sm:$0xff]   ;;  %v1012_v32 = vld [vmem:[%s1367_s1 + $0xe8] ss:$16 sps:$4 sm:$0xff]   ;;  %v73_v3 = vshrl.u32 %v72_v2, 7 }
   0xc   :  { %264 = vmatprep.subr.bf16.mxu0 %v983_v13  ;;  %307 = vmatprep.subr.bf16.mxu1 %v985_v14  ;;  %v1013_v33 = vld [vmem:[%s1368_s0] sm:$0xff]   ;;  %v1018_v38 = vld [vmem:[%s1369_s3 + $0x48] sm:$0xff]   ;;  %v1022_v42 = vld [vmem:[%s1369_s3 + $0x50] sm:$0xff]  }
   0xd   :  { %v1014_v34 = vld [vmem:[%s1369_s3 + $0x40] sm:$0xff]   ;;  %v1019_v39 = vld [vmem:[%s1369_s3 + $0xc8] sm:$0xff]   ;;  %v1023_v43 = vld [vmem:[%s1369_s3 + $0xd0] sm:$0xff]   ;;  %v74_v4 = vsub.s32 0, %v73_v3  ;;  %v82_v5 = vsub.s32 2, %v73_v3  ;;  %v78_v7 = vsub.s32 1, %v73_v3 }
   0xe   :  { %v1015_v35 = vld [vmem:[%s1369_s3 + $0xc0] sm:$0xff]   ;;  %v1020_v40 = vld [vmem:[%s1369_s3 + $0x8] sm:$0xff]   ;;  %v1024_v44 = vld [vmem:[%s1369_s3 + $0x10] sm:$0xff]   ;;  %v86_v8 = vsub.s32 3, %v73_v3 }
   0xf   :  { %265 = vmatpush1.bf16.msra.mxu0 %v987_v15  ;;  %308 = vmatpush1.bf16.msra.mxu1 %v988_v16  ;;  %v1016_v36 = vld [vmem:[%s1369_s3] sm:$0xff]   ;;  %v1021_v41 = vld [vmem:[%s1369_s3 + $0x88] sm:$0xff]   ;;  %v1025_v45 = vld [vmem:[%s1369_s3 + $0x90] sm:$0xff]  }
  0x10   :  { %266 = vmatprep.subr.bf16.mxu0 %v989_v17  ;;  %309 = vmatprep.subr.bf16.mxu1 %v991_v18  ;;  %v1017_v37 = vld [vmem:[%s1369_s3 + $0x80] sm:$0xff]   ;;  %v1026_v46 = vld [vmem:[%s1369_s3 + $0x58] sm:$0xff]   ;;  %v1034_v54 = vld [vmem:[%s1369_s3 + $0x68] sm:$0xff]  }
  0x11   :  { %v1027_v47 = vld [vmem:[%s1369_s3 + $0xd8] sm:$0xff]   ;;  %v1030_v50 = vld [vmem:[%s1369_s3 + $0x60] sm:$0xff]   ;;  %v1035_v55 = vld [vmem:[%s1369_s3 + $0xe8] sm:$0xff]  }
  0x12   :  { %v1028_v48 = vld [vmem:[%s1369_s3 + $0x18] sm:$0xff]   ;;  %v1031_v51 = vld [vmem:[%s1369_s3 + $0xe0] sm:$0xff]   ;;  %v1036_v56 = vld [vmem:[%s1369_s3 + $0x28] sm:$0xff]  }
  0x13   :  { %267 = vmatpush1.bf16.msra.mxu0 %v993_v19  ;;  %310 = vmatpush1.bf16.msra.mxu1 %v994_v20  ;;  %v1029_v49 = vld [vmem:[%s1369_s3 + $0x98] sm:$0xff]   ;;  %v1032_v52 = vld [vmem:[%s1369_s3 + $0x20] sm:$0xff]   ;;  %v1037_v57 = vld [vmem:[%s1369_s3 + $0xa8] sm:$0xff]  }
  0x14   :  { %268 = vmatprep.subr.bf16.mxu0 %v995_v21  ;;  %311 = vmatprep.subr.bf16.mxu1 %v997_v22  ;;  %v1033_v53 = vld [vmem:[%s1369_s3 + $0xa0] sm:$0xff]   ;;  %v1038_v58 = vld [vmem:[%s1369_s3 + $0x70] sm:$0xff]   ;;  %v1042_v62 = vld [vmem:[%s1369_s3 + $0x78] sm:$0xff]  }
  0x15   :  { %v1039_v59 = vld [vmem:[%s1369_s3 + $0xf0] sm:$0xff]   ;;  %v1043_v63 = vld [vmem:[%s1369_s3 + $0xf8] sm:$0xff]   ;;  %v70_v6 = vld [vmem:[%s1370_s2] sm:$0xf] }
  0x16   :  { %v1040_v60 = vld [vmem:[%s1369_s3 + $0x30] sm:$0xff]   ;;  %v1044_v0 = vld [vmem:[%s1369_s3 + $0x38] sm:$0xff]   ;;  %v75_v9 = vrot.slane %v70_v6, %v74_v4  ;;  %v83_v10 = vrot.slane %v70_v6, %v82_v5  ;;  %v79_v11 = vrot.slane %v70_v6, %v78_v7  ;;  %v87_v12 = vrot.slane %v70_v6, %v86_v8 }
  0x17   :  { %269 = vmatpush1.bf16.msra.mxu0 %v999_v23  ;;  %312 = vmatpush1.bf16.msra.mxu1 %v1000_v24  ;;  %v1041_v61 = vld [vmem:[%s1369_s3 + $0xb0] sm:$0xff]   ;;  %v1045_v1 = vld [vmem:[%s1369_s3 + $0xb8] sm:$0xff]  }
  0x18   :  { %270 = vmatprep.subr.bf16.mxu0 %v1001_v25  ;;  %313 = vmatprep.subr.bf16.mxu1 %v1003_v26 }
  0x1b   :  { %271 = vmatpush1.bf16.msra.mxu0 %v1005_v27  ;;  %314 = vmatpush1.bf16.msra.mxu1 %v1006_v28 }
  0x1c   :  { %272 = vmatprep.subr.bf16.mxu0 %v1007_v29  ;;  %315 = vmatprep.subr.bf16.mxu1 %v1009_v30 }
  0x1f   :  { %273 = vmatpush1.bf16.msra.mxu0 %v1011_v31  ;;  %316 = vmatpush1.bf16.msra.mxu1 %v1012_v32 }
  0x20   :  { %920 = vmatprep.subr.bf16.mxu0 %v1014_v34  ;;  %942 = vmatprep.subr.bf16.mxu1 %v1015_v35 }
  0x22   :  { %291 = vmatmul.mubr.bf16.vlgmr.msra.gmra.mrb[0].mxu0 %v1013_v33  ;;  %334 = vmatmul.mubr.bf16.vlgmr.msra.gmra.mrb[0].mxu1 %v1013_v33 }
  0x23   :  { %921 = vmatpush3.bf16.msra.mxu0 %v1016_v36  ;;  %943 = vmatpush3.bf16.msra.mxu1 %v1017_v37 }
  0x24   :  { %922 = vmatprep.subr.bf16.mxu0 %v1018_v38  ;;  %944 = vmatprep.subr.bf16.mxu1 %v1019_v39 }
  0x27   :  { %923 = vmatpush3.bf16.msra.mxu0 %v1020_v40  ;;  %945 = vmatpush3.bf16.msra.mxu1 %v1021_v41 }
  0x28   :  { %924 = vmatprep.subr.bf16.mxu0 %v1022_v42  ;;  %946 = vmatprep.subr.bf16.mxu1 %v1023_v43 }
  0x2b   :  { %925 = vmatpush3.bf16.msra.mxu0 %v1024_v44  ;;  %947 = vmatpush3.bf16.msra.mxu1 %v1025_v45 }
  0x2c   :  { %926 = vmatprep.subr.bf16.mxu0 %v1026_v46  ;;  %948 = vmatprep.subr.bf16.mxu1 %v1027_v47 }
  0x2f   :  { %927 = vmatpush3.bf16.msra.mxu0 %v1028_v48  ;;  %949 = vmatpush3.bf16.msra.mxu1 %v1029_v49 }
  0x30   :  { %928 = vmatprep.subr.bf16.mxu0 %v1030_v50  ;;  %950 = vmatprep.subr.bf16.mxu1 %v1031_v51 }
  0x33   :  { %929 = vmatpush3.bf16.msra.mxu0 %v1032_v52  ;;  %951 = vmatpush3.bf16.msra.mxu1 %v1033_v53 }
  0x34   :  { %930 = vmatprep.subr.bf16.mxu0 %v1034_v54  ;;  %952 = vmatprep.subr.bf16.mxu1 %v1035_v55 }
  0x37   :  { %931 = vmatpush3.bf16.msra.mxu0 %v1036_v56  ;;  %953 = vmatpush3.bf16.msra.mxu1 %v1037_v57 }
  0x38   :  { %932 = vmatprep.subr.bf16.mxu0 %v1038_v58  ;;  %954 = vmatprep.subr.bf16.mxu1 %v1039_v59 }
  0x3b   :  { %933 = vmatpush3.bf16.msra.mxu0 %v1040_v60  ;;  %955 = vmatpush3.bf16.msra.mxu1 %v1041_v61 }
  0x3c   :  { %934 = vmatprep.subr.bf16.mxu0 %v1042_v62  ;;  %956 = vmatprep.subr.bf16.mxu1 %v1043_v63 }
  0x3f   :  { %935 = vmatpush3.bf16.msra.mxu0 %v1044_v0  ;;  %957 = vmatpush3.bf16.msra.mxu1 %v1045_v1 }
  0xf5   :  { %v292_v13 = vpop.f32.mrb[0].mxu0  ;;  %v335_v14 = vpop.f32.mrb[0].mxu1 }
  0xf6   :  { %v1310_v15 = vadd.f32 %v292_v13, %v75_v9  ;;  %v1312_v16 = vadd.f32 %v335_v14, %v83_v10  ;;  %v294_v17 = vpop.f32.mrb[1].mxu0  ;;  %v337_v18 = vpop.f32.mrb[1].mxu1 }
  0xf7   :  { %v1314_v19 = vadd.f32 %v294_v17, %v79_v11  ;;  %v1316_v20 = vadd.f32 %v337_v18, %v87_v12  ;;  %v296_v21 = vpop.f32.mrb[2].mxu0  ;;  %v339_v22 = vpop.f32.mrb[2].mxu1 }
  0xf8   :  { %v352_v23 = vmul.f32 0.044715, %v1310_v15  ;;  %v354_v24 = vmul.f32 0.044715, %v1312_v16  ;;  %v297_v25 = vadd.f32 %v296_v21, %v75_v9  ;;  %v340_v26 = vadd.f32 %v339_v22, %v83_v10  ;;  %v298_v27 = vpop.f32.mrb[3].mxu0  ;;  %v341_v28 = vpop.f32.mrb[3].mxu1 }
  0xf9   :  { %v353_v29 = vmul.f32 0.044715, %v1314_v19  ;;  %v355_v30 = vmul.f32 0.044715, %v1316_v20  ;;  %v1322_v31 = vadd.f32 %v298_v27, %v79_v11  ;;  %v1324_v32 = vadd.f32 %v341_v28, %v87_v12 }
  0xfa   :  { %v360_v33 = vmul.f32 %v352_v23, %v1310_v15  ;;  %v362_v34 = vmul.f32 %v354_v24, %v1312_v16  ;;  %v356_v35 = vmul.f32 0.044715, %v297_v25  ;;  %v358_v36 = vmul.f32 0.044715, %v340_v26 }
  0xfb   :  { %v361_v37 = vmul.f32 %v353_v29, %v1314_v19  ;;  %v363_v38 = vmul.f32 %v355_v30, %v1316_v20  ;;  %v357_v39 = vmul.f32 0.044715, %v1322_v31  ;;  %v359_v40 = vmul.f32 0.044715, %v1324_v32 }
  0xfc   :  { %v368_v41 = vmul.f32 %v360_v33, %v1310_v15  ;;  %v370_v42 = vmul.f32 %v362_v34, %v1312_v16  ;;  %v364_v43 = vmul.f32 %v356_v35, %v297_v25  ;;  %v366_v44 = vmul.f32 %v358_v36, %v340_v26 }
  0xfd   :  { %v369_v45 = vmul.f32 %v361_v37, %v1314_v19  ;;  %v371_v46 = vmul.f32 %v363_v38, %v1316_v20  ;;  %v365_v47 = vmul.f32 %v357_v39, %v1322_v31  ;;  %v367_v48 = vmul.f32 %v359_v40, %v1324_v32 }
  0xfe   :  { %v376_v49 = vadd.f32 %v368_v41, %v1310_v15  ;;  %v378_v50 = vadd.f32 %v370_v42, %v1312_v16  ;;  %v372_v51 = vmul.f32 %v364_v43, %v297_v25  ;;  %v374_v52 = vmul.f32 %v366_v44, %v340_v26 }
  0xff   :  { %v373_v53 = vmul.f32 %v365_v47, %v1322_v31  ;;  %v375_v54 = vmul.f32 %v367_v48, %v1324_v32  ;;  %v377_v59 = vadd.f32 %v369_v45, %v1314_v19  ;;  %v379_v63 = vadd.f32 %v371_v46, %v1316_v20  ;;  %v912_v48 = vld [vmem:[%s1371_s5] sm:$0xff]  }
 0x100   :  { %v384_v55 = vmul.f32 0.7978846, %v376_v49  ;;  %v386_v56 = vmul.f32 0.7978846, %v378_v50  ;;  %v380_v57 = vadd.f32 %v372_v51, %v297_v25  ;;  %v382_v58 = vadd.f32 %v374_v52, %v340_v26 }
 0x101   :  { %v381_v60 = vadd.f32 %v373_v53, %v1322_v31  ;;  %v385_v0 = vmul.f32 0.7978846, %v377_v59  ;;  %v383_v2 = vadd.f32 %v375_v54, %v1324_v32  ;;  %v387_v3 = vmul.f32 0.7978846, %v379_v63  ;;  %v904_v53 = vld [vmem:[%s1372_s4] ss:$0 sm:$0xff] }
 0x102   :  { %1046 = vtanh.f32 %v384_v55  ;;  %v388_v61 = vmul.f32 0.7978846, %v380_v57  ;;  %v390_v62 = vmul.f32 0.7978846, %v382_v58  ;;  %v344_v11 = vmul.f32 0.5, %v1310_v15 }
 0x103   :  { %1048 = vtanh.f32 %v386_v56  ;;  %v389_v1 = vmul.f32 0.7978846, %v381_v60  ;;  %v391_v4 = vmul.f32 0.7978846, %v383_v2  ;;  %v348_v12 = vmul.f32 0.5, %v297_v25 }
 0x104   :  { %1050 = vtanh.f32 %v388_v61  ;;  %v346_v17 = vmul.f32 0.5, %v1312_v16  ;;  %v350_v18 = vmul.f32 0.5, %v340_v26  ;;  %v345_v23 = vmul.f32 0.5, %v1314_v19 }
 0x105   :  { %1052 = vtanh.f32 %v390_v62  ;;  %v349_v30 = vmul.f32 0.5, %v1322_v31  ;;  %v347_v25 = vmul.f32 0.5, %v1316_v20  ;;  %v351_v36 = vmul.f32 0.5, %v1324_v32 }
 0x106   :  { %1054 = vtanh.f32 %v385_v0  ;;  %v913_v56 = vunpack.c.l.bf16 %v912_v48  ;;  %v914_v61 = vunpack.c.h.bf16 %v912_v48 }
 0x107   :  { %1056 = vtanh.f32 %v389_v1 }
 0x108   :  { %1058 = vtanh.f32 %v387_v3 }
 0x109   :  { %1060 = vtanh.f32 %v391_v4 }
 0x10c   :  { %v1047_v5 = vpop.eup %1046 }
 0x10d   :  { %v1049_v6 = vpop.eup %1048  ;;  %v400_v7 = vadd.f32 1.0, %v1047_v5 }
 0x10e   :  { %v1051_v8 = vpop.eup %1050  ;;  %v402_v9 = vadd.f32 1.0, %v1049_v6 }
 0x10f   :  { %v1053_v10 = vpop.eup %1052  ;;  %v404_v13 = vadd.f32 1.0, %v1051_v8  ;;  %v408_v27 = vmul.f32 %v400_v7, %v344_v11 }
 0x110   :  { %v1055_v14 = vpop.eup %1054  ;;  %v406_v21 = vadd.f32 1.0, %v1053_v10  ;;  %v410_v34 = vmul.f32 %v402_v9, %v346_v17  ;;  %v905_v17 = vld [vmem:[%s1373_s6] ss:$0 sm:$0xff] }
 0x111   :  { %v1057_v22 = vpop.eup %1056  ;;  %v401_v24 = vadd.f32 1.0, %v1055_v14  ;;  %v412_v28 = vmul.f32 %v404_v13, %v348_v12 }
 0x112   :  { %v1059_v29 = vpop.eup %1058  ;;  %v405_v33 = vadd.f32 1.0, %v1057_v22  ;;  %v414_v35 = vmul.f32 %v406_v21, %v350_v18 }
 0x113   :  { %v1061_v15 = vpop.eup %1060  ;;  %v403_v16 = vadd.f32 1.0, %v1059_v29  ;;  %v418_v26 = vpack.c.bf16 %v412_v28, %v408_v27  ;;  %v409_v37 = vmul.f32 %v401_v24, %v345_v23  ;;  %v906_v23 = vld [vmem:[%s1374_s7] ss:$0 sm:$0xff] }
 0x114   :  { %v413_v38 = vmul.f32 %v405_v33, %v349_v30  ;;  %v407_v39 = vadd.f32 1.0, %v1061_v15  ;;  %v420_v19 = vpack.c.bf16 %v414_v35, %v410_v34 }
 0x115   :  { %v411_v41 = vmul.f32 %v403_v16, %v347_v25 }
 0x116   :  { %v419_v40 = vpack.c.bf16 %v413_v38, %v409_v37  ;;  %v415_v42 = vmul.f32 %v407_v39, %v351_v36 }
 0x118   :  { %710 = vmatprep.mubr.bf16.mxu0 %v419_v40  ;;  %v421_v43 = vpack.c.bf16 %v415_v42, %v411_v41 }
 0x119   :  { %711 = vmatmul.mubr.bf16.vlgmr.msra.gmra.mrb[4].mxu0 %v418_v26 }
 0x11a   :  { %751 = vmatprep.mubr.bf16.mxu1 %v421_v43 }
 0x11b   :  { %752 = vmatmul.mubr.bf16.vlgmr.msra.gmra.mrb[4].mxu1 %v420_v19 }
 0x1ec   :  { %v936_v31 = vpop.f32.mrb[4].mxu0 }
 0x1ed   :  { %v937_v44 = vpop.f32.mrb[5].mxu0 }
 0x1ee   :  { %v958_v45 = vpop.f32.mrb[4].mxu1  ;;  %v938_v20 = vadd.f32 %v937_v44, %v936_v31  ;;  %v939_v46 = vpop.f32.mrb[6].mxu0 }
 0x1ef   :  { %v959_v32 = vpop.f32.mrb[5].mxu1  ;;  %v940_v47 = vpop.f32.mrb[7].mxu0 }
 0x1f0   :  { %v960_v49 = vadd.f32 %v959_v32, %v958_v45  ;;  %v961_v50 = vpop.f32.mrb[6].mxu1  ;;  %v941_v51 = vadd.f32 %v940_v47, %v939_v46 }
 0x1f1   :  { %v962_v52 = vpop.f32.mrb[7].mxu1 }
 0x1f2   :  { %v754_v54 = vadd.f32 %v960_v49, %v938_v20  ;;  %v963_v55 = vadd.f32 %v962_v52, %v961_v50 }
 0x1f4   :  { %v757_v57 = vadd.f32 %v963_v55, %v941_v51  ;;  %v776_v58 = vadd.f32 %v904_v53, %v754_v54 }
 0x1f6   :  { %v782_v59 = vadd.f32 %v913_v56, %v776_v58  ;;  %v777_v60 = vadd.f32 %v904_v53, %v757_v57 }
 0x1f8   :  { %786 = vadd.xlane.f32.xlu0 %v782_v59  ;;  %v783_v62 = vadd.f32 %v914_v61, %v777_v60 }
 0x1fc   :  { %788 = vadd.xlane.f32.xlu0 %v783_v62 }
 0x285   :  { %v787_v63 = vpop.xlane.xlu0 %786 }
 0x286   :  { %v791_v0 = vmul.f32 0.0078125, %v787_v63 }
 0x288   :  { %v793_v1 = vsub.f32 %v782_v59, %v791_v0 }
 0x289   :  { %v789_v2 = vpop.xlane.xlu0 %788 }
 0x28a   :  { %v792_v3 = vmul.f32 0.0078125, %v789_v2  ;;  %v795_v4 = vmul.f32 %v793_v1, %v793_v1 }
 0x28c   :  { %v794_v5 = vsub.f32 %v783_v62, %v792_v3  ;;  %797 = vadd.xlane.f32.xlu1 %v795_v4 }
 0x28e   :  { %v796_v6 = vmul.f32 %v794_v5, %v794_v5 }
 0x290   :  { %799 = vadd.xlane.f32.xlu1 %v796_v6 }
 0x319   :  { %v798_v7 = vpop.xlane.xlu1 %797 }
 0x31a   :  { %v801_v8 = vmul.f32 0.0078125, %v798_v7 }
 0x31c   :  { %v803_v9 = vadd.f32 1e-12, %v801_v8 }
 0x31d   :  { %v800_v10 = vpop.xlane.xlu1 %799 }
 0x31e   :  { %1062 = vrsqrt.f32 %v803_v9  ;;  %v802_v11 = vmul.f32 0.0078125, %v800_v10 }
 0x320   :  { %v804_v12 = vadd.f32 1e-12, %v802_v11 }
 0x322   :  { %1064 = vrsqrt.f32 %v804_v12 }
 0x328   :  { %v1063_v13 = vpop.eup %1062 }
 0x329   :  { %v807_v14 = vmul.f32 %v1063_v13, %v793_v1 }
 0x32b   :  { %v815_v21 = vmul.f32 %v905_v17, %v807_v14 }
 0x32c   :  { %v1065_v18 = vpop.eup %1064 }
 0x32d   :  { %v808_v22 = vmul.f32 %v1065_v18, %v794_v5  ;;  %v823_v27 = vadd.f32 %v906_v23, %v815_v21 }
 0x32f   :  { %v816_v24 = vmul.f32 %v905_v17, %v808_v22 }
 0x331   :  { %v824_v28 = vadd.f32 %v906_v23, %v816_v24 }
 0x333   :  { %v918_v29 = vpack.c.bf16 %v824_v28, %v823_v27 }
 0x335   :  { %919 = vst [vmem:[%s1375_s8] sm:$0xff] %v918_v29  }

// kernel: robert_forward.15
= control target key start
LH: loop header
LB: loop body
LE: loop exit
PB: predicated region body
PF: predicated region fallthrough
CT: control target
= control target key end

     0   :  { %14 = vsyncpa [#allocation3], 0  ;;  %v507_v1 = vmov 0.0   ;;  %vm508_vm0 = vmmov 0   ;;  %s658_s0 = inlined_call_operand.vmem [shape: bf16[2,128], index: 0, kind: input, shape index: {}]   ;;  %s659_s1 = inlined_call_operand.vmem [shape: bf16[128,128], index: 1, kind: input, shape index: {}]   ;;  %s660_s2 = inlined_call_operand.vmem [shape: f32[1,128], index: 2, kind: input, shape index: {}]   ;;  %s661_s3 = inlined_call_operand.vmem [shape: bf16[128,2], index: 3, kind: input, shape index: {}]   ;;  %s662_s4 = inlined_call_operand.vmem [shape: f32[1,2], index: 4, kind: input, shape index: {}]   ;;  %s663_s5 = inlined_call_operand.vmem [shape: f32[2,2], index: 5, kind: input, shape index: {}]   ;;  %s664_s6 = inlined_call_operand.hbm [shape: f32[2,2], index: 6, kind: output, shape index: {0}]   ;;  %s665_s7 = inlined_call_operand.hbm [shape: f32[2,2], index: 7, kind: output, shape index: {1}]   ;;  %s666_s8 = inlined_call_operand.hbm [shape: f32[1,1], index: 8, kind: output, shape index: {2}]  }
   0x1   :  { %v413_v0 = vld [vmem:[%s659_s1] sm:$0xff]   ;;  %366 = vmatprep.subr.bf16.mxu0 %v507_v1  ;;  %386 = vmatprep.subr.bf16.mxu1 %v507_v1  ;;  %v414_v2 = vld [vmem:[%s659_s1 + $0x8] sm:$0xff]   ;;  %v415_v3 = vld [vmem:[%s659_s1 + $0x10] sm:$0xff]  }
   0x2   :  { %367 = vmatpush3.bf16.msra.mxu0 %v413_v0  ;;  %382 = vmatprep.mubr.msk.bf16.mxu0 %vm508_vm0, %v507_v1  ;;  %v421_v4 = vld [vmem:[%s661_s3] sm:$0xff]   ;;  %v416_v5 = vld [vmem:[%s659_s1 + $0x18] sm:$0xff]   ;;  %v422_v6 = vld [vmem:[%s661_s3 + $0x8] sm:$0xff]  }
   0x3   :  { %368 = vmatprep.subr.bf16.mxu0 %v507_v1  ;;  %402 = vmatprep.mubr.msk.bf16.mxu1 %vm508_vm0, %v507_v1  ;;  %v417_v7 = vld [vmem:[%s659_s1 + $0x20] sm:$0xff]   ;;  %v423_v8 = vld [vmem:[%s661_s3 + $0x10] sm:$0xff]  }
   0x4   :  { %387 = vmatpush3.bf16.msra.mxu1 %v421_v4 }
   0x5   :  { %388 = vmatprep.subr.bf16.mxu1 %v507_v1 }
   0x6   :  { %369 = vmatpush3.bf16.msra.mxu0 %v414_v2 }
   0x7   :  { %370 = vmatprep.subr.bf16.mxu0 %v507_v1 }
   0x8   :  { %389 = vmatpush3.bf16.msra.mxu1 %v422_v6 }
   0xa   :  { %371 = vmatpush3.bf16.msra.mxu0 %v415_v3 }
   0xb   :  { %372 = vmatprep.subr.bf16.mxu0 %v507_v1 }
   0xe   :  { %373 = vmatpush3.bf16.msra.mxu0 %v416_v5 }
   0xf   :  { %374 = vmatprep.subr.bf16.mxu0 %v507_v1 }
  0x10   :  { %15 = vsyncpa [#allocation5], 0  ;;  %390 = vmatprep.subr.bf16.mxu1 %v507_v1  ;;  %v418_v9 = vld [vmem:[%s659_s1 + $0x28] sm:$0xff]   ;;  %v424_v10 = vld [vmem:[%s661_s3 + $0x18] sm:$0xff]   ;;  %vm254_vm1 = vcmask 9216   ;;  %s510_s20 = smov [#allocation2]  }
  0x11   :  { %391 = vmatpush3.bf16.msra.mxu1 %v423_v8  ;;  %v419_v11 = vld [vmem:[%s659_s1 + $0x30] sm:$0xff]   ;;  %v420_v12 = vld [vmem:[%s659_s1 + $0x38] sm:$0xff]   ;;  %v29_v13 = vld [vmem:[%s658_s0] sm:$0x1]  ;;  %s295_s21 = sshll.u32 %s510_s20, 4  ;;  %s296_s21 = int_to_ptr.vmem [resolvable:$true] %s295_s21 }
  0x12   :  { %375 = vmatpush3.bf16.msra.mxu0 %v417_v7  ;;  %392 = vmatprep.subr.bf16.mxu1 %v507_v1  ;;  %v425_v14 = vld [vmem:[%s661_s3 + $0x20] sm:$0xff]   ;;  %v426_v15 = vld [vmem:[%s661_s3 + $0x28] sm:$0xff]   ;;  %v427_v16 = vld [vmem:[%s661_s3 + $0x30] sm:$0xff]  }
  0x13   :  { %376 = vmatprep.subr.bf16.mxu0 %v507_v1  ;;  %v428_v17 = vld [vmem:[%s661_s3 + $0x38] sm:$0xff]   ;;  %v330_v18 = vld [vmem:[%s660_s2] ss:$0 sm:$0xff] }
  0x14   :  { %v339_v26 = vld [vmem:[%s662_s4] ss:$0 sm:$0xff]  ;;  %s509_s4 = smov [#allocation4]  }
  0x15   :  { %393 = vmatpush3.bf16.msra.mxu1 %v424_v10  ;;  %v271_v43 = vld [vmem:[%s663_s5] sm:$0x3]  ;;  %s305_s19 = sshll.u32 %s509_s4, 4  ;;  %s306_s19 = int_to_ptr.vmem [resolvable:$true] %s305_s19 }
  0x16   :  { %377 = vmatpush3.bf16.msra.mxu0 %v418_v9  ;;  %394 = vmatprep.subr.bf16.mxu1 %v507_v1  ;;  %s437_s22 = scalar_lea.vmem %s306_s19, 32  ;;  %p442_p1 = scmp.lt.s32.totalorder %s306_s19, %s306_s19 }
  0x17   :  { %378 = vmatprep.subr.bf16.mxu0 %v507_v1  ;;  %p438_p0 = scmp.ne.s32.totalorder %s306_s19, %s437_s22  ;;  %p443_p2 = scmp.lt.s32.totalorder %s437_s22, %s437_s22 }
  0x19   :  { %395 = vmatpush3.bf16.msra.mxu1 %v425_v14  ;;  %p444_p3 = por %p443_p2, %p442_p1 }
  0x1a   :  { %379 = vmatpush3.bf16.msra.mxu0 %v419_v11  ;;  %396 = vmatprep.subr.bf16.mxu1 %v507_v1 }
  0x1b   :  { %380 = vmatprep.subr.bf16.mxu0 %v507_v1  ;;  %p445_p4 = pnand %p444_p3, %p438_p0 }
  0x1d   :  { %397 = vmatpush3.bf16.msra.mxu1 %v426_v15 }
  0x1e   :  { %381 = vmatpush3.bf16.msra.mxu0 %v420_v12  ;;  %398 = vmatprep.subr.bf16.mxu1 %v507_v1 }
  0x21   :  { %383 = vmatmul.mubr.bf16.vlgmr.msra.gmra.mrb[0].mxu0 %v29_v13  ;;  %399 = vmatpush3.bf16.msra.mxu1 %v427_v16 }
  0x22   :  { %400 = vmatprep.subr.bf16.mxu1 %v507_v1 }
  0x25   :  { %401 = vmatpush3.bf16.msra.mxu1 %v428_v17 }
  0xf4   :  { %v135_v19 = vpop.f32.mrb[0].mxu0 }
  0xf5   :  { %v136_v20 = vadd.f32 %v330_v18, %v135_v19  ;;  %v384_v21 = vpop.f32.mrb[1].mxu0 }
  0xf6   :  { %v138_v22 = vpop.f32.mrb[2].mxu0 }
  0xf7   :  { %429 = vtanh.f32 %v136_v20  ;;  %v385_v23 = vpop.f32.mrb[3].mxu0 }
 0x101   :  { %v430_v24 = vpop.eup %429 }
 0x102   :  { %v142_v25 = vpack.c.bf16 %v430_v24, %v430_v24 }
 0x104   :  { %403 = vmatmul.mubr.bf16.vlgmr.msra.gmra.mrb[0].mxu1 %v142_v25 }
 0x1d7   :  { %v248_v27 = vpop.f32.mrb[0].mxu1 }
 0x1d8   :  { %v249_v28 = vadd.f32 %v339_v26, %v248_v27  ;;  %v404_v29 = vpop.f32.mrb[1].mxu1 }
 0x1d9   :  { %v251_v30 = vpop.f32.mrb[2].mxu1 }
 0x1da   :  { %v405_v31 = vpop.f32.mrb[3].mxu1  ;;  %v256_v32 = vsel %vm254_vm1, %v249_v28, -inf  ;;  %255 = vst.msk [vmem:[#allocation2] sm:$0x3] %vm254_vm1, %v249_v28 }
 0x1db   :  { %257 = vmax.xlane.f32.xlu0 %v256_v32 }
 0x268   :  { %v258_v33 = vpop.xlane.xlu0 %257 }
 0x269   :  { %v259_v34 = vsub.f32 %v249_v28, %v258_v33 }
 0x26b   :  { %v260_v35 = vmul.f32 1.442695, %v259_v34 }
 0x26d   :  { %431 = vpow2.f32 %v260_v35 }
 0x277   :  { %v432_v36 = vpop.eup %431 }
 0x278   :  { %v262_v37 = vsel %vm254_vm1, %v432_v36, 0.0 }
 0x279   :  { %263 = vadd.xlane.f32.xlu0 %v262_v37 }
 0x306   :  { %v264_v38 = vpop.xlane.xlu0 %263 }
 0x307   :  { %433 = vrcp.f32 %v264_v38 }
 0x308   :  { %435 = vlog2.f32 %v264_v38 }
 0x311   :  { %v434_v39 = vpop.eup %433 }
 0x312   :  { %v436_v40 = vpop.eup %435  ;;  %v266_v41 = vmul.f32 %v434_v39, %v432_v36 }
 0x313   :  { %v269_v42 = vmul.f32 0.6931472, %v436_v40 }
 0x314   :  { %267 = vst.msk [vmem:[#allocation4] sm:$0x3] %vm254_vm1, %v266_v41 }
 0x315   :  { %v270_v44 = vsub.f32 %v259_v34, %v269_v42 }
 0x317   :  { %v272_v45 = vmul.f32 %v271_v43, %v270_v44 }
 0x319   :  { %v273_v46 = vsel %vm254_vm1, %v272_v45, 0.0 }
 0x31a   :  { %274 = vadd.xlane.f32.xlu1 %v273_v46 }
 0x31b   :  { %448 = shalt.err (!%p445_p4)
}
 0x31c   :  { %s449_s24 = scalar_lea.hbm %s665_s7, 32 }
 0x31d   :  { %p450_p5 = scmp.ne.s32.totalorder %s665_s7, %s449_s24  ;;  %p453_p6 = scmp.lt.u32.totalorder %s449_s24, %s665_s7 }
 0x31f   :  { %p455_p7 = pnand %p453_p6, %p450_p5 }
 0x321   :  { %458 = shalt.err (!%p455_p7)
}
 0x322   :  { %308 = dma.vmem_to_hbm [thread:$0]  %s306_s19, 32, %s665_s7, [#allocation5]  }
 0x323   :  { %s459_s9 = scalar_lea.vmem %s296_s21, 32  ;;  %p464_p9 = scmp.lt.s32.totalorder %s296_s21, %s296_s21 }
 0x324   :  { %p460_p8 = scmp.ne.s32.totalorder %s296_s21, %s459_s9  ;;  %p465_p10 = scmp.lt.s32.totalorder %s459_s9, %s459_s9 }
 0x326   :  { %p466_p11 = por %p465_p10, %p464_p9 }
 0x328   :  { %p467_p12 = pnand %p466_p11, %p460_p8 }
 0x32a   :  { %470 = shalt.err (!%p467_p12)
}
 0x32b   :  { %s471_s12 = scalar_lea.hbm %s664_s6, 32 }
 0x32c   :  { %p472_p13 = scmp.ne.s32.totalorder %s664_s6, %s471_s12  ;;  %p475_p0 = scmp.lt.u32.totalorder %s471_s12, %s664_s6 }
 0x32e   :  { %p477_p1 = pnand %p475_p0, %p472_p13 }
 0x330   :  { %480 = shalt.err (!%p477_p1)
}
 0x331   :  { %298 = dma.vmem_to_hbm [thread:$0]  %s296_s21, 32, %s664_s6, [#allocation3]   ;;  %vm287_vm2 = vcmask 0  }
 0x332   :  { %s511_s17 = smov [#allocation6]  }
 0x333   :  { %s315_s18 = sshll.u32 %s511_s17, 4  ;;  %s316_s18 = int_to_ptr.vmem [resolvable:$true] %s315_s18 }
 0x334   :  { %s481_s2 = scalar_lea.vmem %s316_s18, 16  ;;  %s485_s6 = scalar_lea.vmem %s316_s18, 32 }
 0x335   :  { %p482_p2 = scmp.ne.s32.totalorder %s316_s18, %s481_s2  ;;  %p486_p3 = scmp.lt.s32.totalorder %s316_s18, %s316_s18 }
 0x336   :  { %p487_p4 = scmp.lt.s32.totalorder %s485_s6, %s481_s2 }
 0x338   :  { %p488_p5 = por %p487_p4, %p486_p3 }
 0x33a   :  { %p489_p6 = pnand %p488_p5, %p482_p2 }
 0x3a7   :  { %v275_v47 = vpop.xlane.xlu1 %274 }
 0x3a8   :  { %v276_v48 = vrot.slane %v275_v47, 4 }
 0x3aa   :  { %v277_v49 = vadd.f32 %v276_v48, %v275_v47 }
 0x3ac   :  { %v278_v50 = vrot.slane %v277_v49, 2 }
 0x3ae   :  { %v279_v51 = vadd.f32 %v278_v50, %v277_v49 }
 0x3b0   :  { %v280_v52 = vrot.slane %v279_v51, 1 }
 0x3b2   :  { %v281_v53 = vadd.f32 %v280_v52, %v279_v51 }
 0x3b4   :  { %406 = vpush %v281_v53 }
 0x3e5   :  { %s407_s16 = spop %406 }
 0x3e6   :  { %v283_v54 = vstv %s407_s16 }
 0x3e7   :  { %v284_v55 = vsub.f32 0.0, %v283_v54 }
 0x3e9   :  { %v286_v56 = vmul.f32 0.5, %v284_v55 }
 0x3eb   :  { %288 = vst.msk [vmem:[#allocation6] sm:$0x1] %vm287_vm2, %v286_v56 }
 0x3ec   :  { %492 = shalt.err (!%p489_p6)
}
 0x3ed   :  { %s493_s19 = scalar_lea.hbm %s666_s8, 16 }
 0x3ee   :  { %p494_p7 = scmp.ne.s32.totalorder %s666_s8, %s493_s19  ;;  %p497_p8 = scmp.lt.u32.totalorder %s493_s19, %s666_s8 }
 0x3f0   :  { %p499_p9 = pnand %p497_p8, %p494_p7 }
 0x3f2   :  { %502 = shalt.err (!%p499_p9)
}
 0x3f3   :  { %318 = dma.vmem_to_hbm [thread:$0]  %s316_s18, 16, %s666_s8, [#allocation5]  }
 0x3f4   :  { %503 = dma.done.wait [#allocation3], 32  }
 0x3f5   :  { %504 = vsyncadd [#allocation3], 4294967264 }
 0x3f6   :  { %505 = dma.done.wait [#allocation5], 48  }
 0x3f7   :  { %506 = vsyncadd [#allocation5], 4294967248 }
 0x3f8   :  { %328 = vsyncpa [#allocation3], 1 }
 0x3f9   :  { %329 = vsyncpa [#allocation5], 1 }

</bundles_post_ra>
